<compile_context>
chip_gen: v7x
topology: tpu7x:2x2x1
jax: 0.10.0
libtpu: 0.0.40
codegen_flags: <defaults>
</compile_context>

<pallas_src>
import functools

import jax
import jax.numpy as jnp
from jax import lax
from jax.experimental import pallas as pl
from jax.experimental.pallas import tpu as pltpu

LN_EPS = 1e-5  # nn.LayerNorm default


def _round_up(n: int, m: int) -> int:
    return pl.cdiv(n, m) * m


def ffn_kernel(x_ref, w1_ref, b1_ref, w2_ref, b2_ref, g_ref, beta_ref,
               o_ref, acc_ref, *, compression: float, d_model: int, eps: float):
    """Grid = (row_tiles, d_ff_tiles). Accumulate fc2 over the f axis, finalize on last."""
    f = pl.program_id(1)

    @pl.when(f == 0)
    def _init():
        acc_ref[...] = jnp.zeros_like(acc_ref)

    x = x_ref[...]                                            # (tm, Dp) activations

    # fc1 block + bias + ReLU (MXU in compute dtype, f32 accumulation)
    h = jnp.dot(x.astype(w1_ref.dtype), w1_ref[...],
                preferred_element_type=jnp.float32)
    h = jnp.maximum(h + b1_ref[...], 0.0)                     # (tm, tf), f32

    # partial fc2: accumulate into f32 VMEM scratch
    acc_ref[...] += jnp.dot(h.astype(w2_ref.dtype), w2_ref[...],
                            preferred_element_type=jnp.float32)

    # TODO(synk): nn.Dropout is identity in eval mode; training-mode dropout would
    # use pltpu.prng_seed + pltpu.prng_random_bits — intentionally omitted here.

    @pl.when(f == pl.num_programs(1) - 1)
    def _finalize():
        y = acc_ref[...] + b2_ref[...]                        # add b2 once, not per f-block
        z = x.astype(jnp.float32) + y * compression           # residual + compression scale

        inv_d = 1.0 / d_model
        mu = jnp.sum(z, axis=-1, keepdims=True) * inv_d
        centered = z - mu
        if d_model != z.shape[-1]:
            # d_model was padded for lane density: exclude pad columns from the variance.
            col = lax.broadcasted_iota(jnp.int32, z.shape, 1)
            centered_v = jnp.where(col < d_model, centered, 0.0)
        else:
            centered_v = centered
        var = jnp.sum(centered_v * centered_v, axis=-1, keepdims=True) * inv_d
        zn = centered * lax.rsqrt(var + eps)
        o_ref[...] = (zn * g_ref[...] + beta_ref[...]).astype(o_ref.dtype)


def stretch_field_ffn(x, params, dps: float, *, tm: int = 256, tf: int = 512,
                      compute_dtype=jnp.bfloat16):
    """x: (B, S, d_model). Returns (B, S, d_model) with x.dtype."""
    assert tm % 8 == 0 and tf % 128 == 0
    B, S, d_model = x.shape
    M = B * S
    d_ff = params["w1"].shape[1]

    compression = 1.0 if dps < 1.0 else 0.85

    # Padded, aligned sizes (lane-dense last dim, sublane-aligned rows).
    Dp = _round_up(d_model, 128)
    tm_eff = min(tm, _round_up(M, 8))
    tf_eff = min(tf, _round_up(d_ff, 128))
    Mp = _round_up(M, tm_eff)
    Fp = _round_up(d_ff, tf_eff)

    # Pad operands. Zero-padding keeps the math exact: padded d_model columns of
    # W2/b2/gamma/beta and padded d_ff columns/rows of W1/W2 contribute nothing.
    x2d = jnp.pad(x.reshape(M, d_model), ((0, Mp - M), (0, Dp - d_model)))
    w1 = jnp.pad(params["w1"], ((0, Dp - d_model), (0, Fp - d_ff))).astype(compute_dtype)
    w2 = jnp.pad(params["w2"], ((0, Fp - d_ff), (0, Dp - d_model))).astype(compute_dtype)
    b1 = jnp.pad(params["b1"], (0, Fp - d_ff)).reshape(1, Fp).astype(jnp.float32)
    b2 = jnp.pad(params["b2"], (0, Dp - d_model)).reshape(1, Dp).astype(jnp.float32)
    gamma = jnp.pad(params["gamma"], (0, Dp - d_model)).reshape(1, Dp).astype(jnp.float32)
    beta = jnp.pad(params["beta"], (0, Dp - d_model)).reshape(1, Dp).astype(jnp.float32)

    grid = (Mp // tm_eff, Fp // tf_eff)

    # VMEM budget (double-buffered inputs/outputs + accumulator) with headroom,
    # clamped to a limit that fits every generation (incl. v7x 64 MiB).
    wbytes = jnp.dtype(compute_dtype).itemsize
    xbytes = jnp.dtype(x.dtype).itemsize
    vmem_needed = (2 * tm_eff * Dp * xbytes          # x tiles
                   + 2 * Dp * tf_eff * wbytes        # w1 blocks
                   + 2 * tf_eff * Dp * wbytes        # w2 blocks
                   + 2 * tf_eff * 4                  # b1
                   + 2 * 3 * Dp * 4                  # b2, gamma, beta
                   + 2 * tm_eff * Dp * xbytes        # out tiles
                   + tm_eff * Dp * 4)                # accumulator scratch
    vmem_limit = int(min(max(2 * vmem_needed, 16 * 1024 * 1024), 48 * 1024 * 1024))

    cost = pl.CostEstimate(
        flops=int(4 * M * d_model * d_ff),           # two matmuls
        transcendentals=int(M),                      # one rsqrt per row
        bytes_accessed=int(M * d_model * xbytes * 2  # x in + out
                           + 2 * d_model * d_ff * wbytes))

    kernel = functools.partial(ffn_kernel, compression=compression,
                               d_model=d_model, eps=LN_EPS)

    out = pl.pallas_call(
        kernel,
        out_shape=jax.ShapeDtypeStruct((Mp, Dp), x.dtype),
        grid=grid,
        in_specs=[
            pl.BlockSpec((tm_eff, Dp), lambda i, f: (i, 0)),    # x row tile (constant over f)
            pl.BlockSpec((Dp, tf_eff), lambda i, f: (0, f)),    # W1 column block
            pl.BlockSpec((1, tf_eff), lambda i, f: (0, f)),     # b1 block
            pl.BlockSpec((tf_eff, Dp), lambda i, f: (f, 0)),    # W2 row block
            pl.BlockSpec((1, Dp), lambda i, f: (0, 0)),         # b2
            pl.BlockSpec((1, Dp), lambda i, f: (0, 0)),         # gamma
            pl.BlockSpec((1, Dp), lambda i, f: (0, 0)),         # beta
        ],
        out_specs=pl.BlockSpec((tm_eff, Dp), lambda i, f: (i, 0)),
        scratch_shapes=[pltpu.VMEM((tm_eff, Dp), jnp.float32)],
        compiler_params=pltpu.CompilerParams(
            dimension_semantics=("parallel", "arbitrary"),
            vmem_limit_bytes=vmem_limit),
        cost_estimate=cost,
    )(x2d, w1, b1, w2, b2, gamma, beta)

    return out[:M, :d_model].reshape(B, S, d_model)


def init_params(key, d_model: int, d_ff: int):
    """Deterministic init mimicking nn.Linear default (uniform +-1/sqrt(fan_in))."""
    k1, k2, k3, k4 = jax.random.split(key, 4)
    lim1 = 1.0 / (d_model ** 0.5)
    lim2 = 1.0 / (d_ff ** 0.5)
    return {
        # stored pre-transposed: (in, out)
        "w1": jax.random.uniform(k1, (d_model, d_ff), jnp.float32, -lim1, lim1),
        "b1": jax.random.uniform(k2, (d_ff,), jnp.float32, -lim1, lim1),
        "w2": jax.random.uniform(k3, (d_ff, d_model), jnp.float32, -lim2, lim2),
        "b2": jax.random.uniform(k4, (d_model,), jnp.float32, -lim2, lim2),
        "gamma": jnp.ones((d_model,), jnp.float32),
        "beta": jnp.zeros((d_model,), jnp.float32),
    }


def reference_ffn(x, params, dps: float):
    """Pure-JAX f32 reference of the PyTorch forward (eval-mode dropout)."""
    h = jnp.maximum(x @ params["w1"] + params["b1"], 0.0)
    y = h @ params["w2"] + params["b2"]
    compression = 1.0 if dps < 1.0 else 0.85
    z = x + y * compression
    mu = jnp.mean(z, axis=-1, keepdims=True)
    var = jnp.mean((z - mu) ** 2, axis=-1, keepdims=True)
    zn = (z - mu) / jnp.sqrt(var + LN_EPS)
    return zn * params["gamma"] + params["beta"]


if __name__ == "__main__":
    B, S, d_model, d_ff = 2, 128, 128, 512

    key = jax.random.PRNGKey(0)
    kx, kp = jax.random.split(key)
    x = jax.random.normal(kx, (B, S, d_model), dtype=jnp.float32)
    params = init_params(kp, d_model, d_ff)

    # f32 compute path (tight check), dps < 1.0 -> compression = 1.0
    out_f32 = stretch_field_ffn(x, params, 0.5, tm=128, tf=256,
                                compute_dtype=jnp.float32)
    out_f32 = jax.block_until_ready(out_f32)
    ref_a = reference_ffn(x, params, 0.5)
    assert out_f32.shape == (B, S, d_model)
    assert jnp.allclose(out_f32, ref_a, atol=1e-4, rtol=1e-4), "f32 mismatch vs reference"

    # bf16 MXU path (perf config), dps >= 1.0 -> compression = 0.85
    out_bf16 = stretch_field_ffn(x, params, 1.5, tm=128, tf=256,
                                 compute_dtype=jnp.bfloat16)
    out_bf16 = jax.block_until_ready(out_bf16)
    ref_b = reference_ffn(x, params, 1.5)
    assert out_bf16.shape == (B, S, d_model)
    assert jnp.allclose(out_bf16, ref_b, atol=2e-2, rtol=2e-2), "bf16 mismatch vs reference"

    print("KERNEL_OK")
</pallas_src>

<mosaic_0001>
module attributes {stable_mosaic.version = 11 : i64} {
  func.func @ffn_kernel(%arg0: i32, %arg1: i32, %arg2: memref<128x128xf32, #tpu.memory_space<vmem>>, %arg3: memref<128x256xf32, #tpu.memory_space<vmem>>, %arg4: memref<1x256xf32, #tpu.memory_space<vmem>>, %arg5: memref<256x128xf32, #tpu.memory_space<vmem>>, %arg6: memref<1x128xf32, #tpu.memory_space<vmem>>, %arg7: memref<1x128xf32, #tpu.memory_space<vmem>>, %arg8: memref<1x128xf32, #tpu.memory_space<vmem>>, %arg9: memref<128x128xf32, #tpu.memory_space<vmem>>, %arg10: memref<128x128xf32, #tpu.memory_space<vmem>>) attributes {dimension_semantics = [#tpu.dimension_semantics<parallel>, #tpu.dimension_semantics<arbitrary>], iteration_bounds = array<i64: 2, 2>, scalar_prefetch = 0 : i64, scratch_operands = 1 : i64, tpu.core_type = #tpu.core_type<tc>, window_params = [{transform_indices = @transform_0, window_bounds = array<i64: 128, 128>}, {transform_indices = @transform_1, window_bounds = array<i64: 128, 256>}, {transform_indices = @transform_2, window_bounds = array<i64: 1, 256>}, {transform_indices = @transform_3, window_bounds = array<i64: 256, 128>}, {pipeline_mode = #tpu.pipeline_mode<synchronous>, transform_indices = @transform_4, window_bounds = array<i64: 1, 128>}, {pipeline_mode = #tpu.pipeline_mode<synchronous>, transform_indices = @transform_5, window_bounds = array<i64: 1, 128>}, {pipeline_mode = #tpu.pipeline_mode<synchronous>, transform_indices = @transform_6, window_bounds = array<i64: 1, 128>}, {transform_indices = @transform_7, window_bounds = array<i64: 128, 128>}]} {
    %c0_i32 = arith.constant 0 : i32
    %0 = arith.cmpi eq, %arg1, %c0_i32 : i32
    %1 = arith.extui %0 : i1 to i32
    %c0_i32_0 = arith.constant 0 : i32
    %2 = arith.cmpi ne, %1, %c0_i32_0 : i32
    scf.if %2 {
      %cst_15 = arith.constant 0.000000e+00 : f32
      %19 = vector.broadcast %cst_15 : f32 to vector<128x128xf32>
      %c0_16 = arith.constant 0 : index
      %c0_17 = arith.constant 0 : index
      %20 = vector.load %arg10[%c0_16, %c0_17] : memref<128x128xf32, #tpu.memory_space<vmem>>, vector<128x128xf32>
      tpu.vector_store %arg10[%c0_16, %c0_17], %19 {strides = array<i32>} : memref<128x128xf32, #tpu.memory_space<vmem>>, vector<128x128xf32>,
    } else {
    }
    %c0 = arith.constant 0 : index
    %c0_1 = arith.constant 0 : index
    %3 = vector.load %arg2[%c0, %c0_1] : memref<128x128xf32, #tpu.memory_space<vmem>>, vector<128x128xf32>
    %c0_2 = arith.constant 0 : index
    %c0_3 = arith.constant 0 : index
    %4 = vector.load %arg3[%c0_2, %c0_3] : memref<128x256xf32, #tpu.memory_space<vmem>>, vector<128x256xf32>
    %cst = arith.constant dense<0.000000e+00> : vector<128x256xf32>
    %5 = tpu.matmul %3, %4, %cst {dimension_numbers = #tpu.dot_dimension_numbers<[1], [0], [0], [1], [0, 0, 1, 1], [], []>} : vector<128x128xf32>, vector<128x256xf32>, vector<128x256xf32> -> vector<128x256xf32>
    %c0_4 = arith.constant 0 : index
    %c0_5 = arith.constant 0 : index
    %6 = vector.load %arg4[%c0_4, %c0_5] : memref<1x256xf32, #tpu.memory_space<vmem>>, vector<1x256xf32>
    %7 = vector.broadcast %6 : vector<1x256xf32> to vector<128x256xf32>
    %8 = arith.addf %5, %7 : vector<128x256xf32>
    %cst_6 = arith.constant 0.000000e+00 : f32
    %9 = vector.broadcast %cst_6 : f32 to vector<128x256xf32>
    %10 = arith.maximumf %8, %9 : vector<128x256xf32>
    %c0_7 = arith.constant 0 : index
    %c0_8 = arith.constant 0 : index
    %11 = vector.load %arg10[%c0_7, %c0_8] : memref<128x128xf32, #tpu.memory_space<vmem>>, vector<128x128xf32>
    %c0_9 = arith.constant 0 : index
    %c0_10 = arith.constant 0 : index
    %12 = vector.load %arg5[%c0_9, %c0_10] : memref<256x128xf32, #tpu.memory_space<vmem>>, vector<256x128xf32>
    %cst_11 = arith.constant dense<0.000000e+00> : vector<128x128xf32>
    %13 = tpu.matmul %10, %12, %cst_11 {dimension_numbers = #tpu.dot_dimension_numbers<[1], [0], [0], [1], [0, 0, 1, 1], [], []>} : vector<128x256xf32>, vector<256x128xf32>, vector<128x128xf32> -> vector<128x128xf32>
    %14 = arith.addf %11, %13 : vector<128x128xf32>
    %c0_12 = arith.constant 0 : index
    %c0_13 = arith.constant 0 : index
    %15 = vector.load %arg10[%c0_12, %c0_13] : memref<128x128xf32, #tpu.memory_space<vmem>>, vector<128x128xf32>
    tpu.vector_store %arg10[%c0_12, %c0_13], %14 {strides = array<i32>} : memref<128x128xf32, #tpu.memory_space<vmem>>, vector<128x128xf32>,
    %c1_i32 = arith.constant 1 : i32
    %16 = arith.cmpi eq, %arg1, %c1_i32 : i32
    %17 = arith.extui %16 : i1 to i32
    %c0_i32_14 = arith.constant 0 : i32
    %18 = arith.cmpi ne, %17, %c0_i32_14 : i32
    scf.if %18 {
      %c0_15 = arith.constant 0 : index
      %c0_16 = arith.constant 0 : index
      %19 = vector.load %arg10[%c0_15, %c0_16] : memref<128x128xf32, #tpu.memory_space<vmem>>, vector<128x128xf32>
      %c0_17 = arith.constant 0 : index
      %c0_18 = arith.constant 0 : index
      %20 = vector.load %arg6[%c0_17, %c0_18] : memref<1x128xf32, #tpu.memory_space<vmem>>, vector<1x128xf32>
      %21 = vector.broadcast %20 : vector<1x128xf32> to vector<128x128xf32>
      %22 = arith.addf %19, %21 : vector<128x128xf32>
      %cst_19 = arith.constant 1.000000e+00 : f32
      %23 = vector.broadcast %cst_19 : f32 to vector<128x128xf32>
      %24 = arith.mulf %22, %23 : vector<128x128xf32>
      %25 = arith.addf %3, %24 : vector<128x128xf32>
      %cst_20 = arith.constant dense<0.000000e+00> : vector<128xf32>
      %26 = vector.multi_reduction <add>, %25, %cst_20 [1] : vector<128x128xf32> to vector<128xf32>
      %27 = vector.shape_cast %26 : vector<128xf32> to vector<128x1xf32>
      %cst_21 = arith.constant 7.812500e-03 : f32
      %28 = vector.broadcast %cst_21 : f32 to vector<128x1xf32>
      %29 = arith.mulf %27, %28 : vector<128x1xf32>
      %30 = vector.broadcast %29 : vector<128x1xf32> to vector<128x128xf32>
      %31 = arith.subf %25, %30 : vector<128x128xf32>
      %32 = arith.mulf %31, %31 : vector<128x128xf32>
      %cst_22 = arith.constant dense<0.000000e+00> : vector<128xf32>
      %33 = vector.multi_reduction <add>, %32, %cst_22 [1] : vector<128x128xf32> to vector<128xf32>
      %34 = vector.shape_cast %33 : vector<128xf32> to vector<128x1xf32>
      %cst_23 = arith.constant 7.812500e-03 : f32
      %35 = vector.broadcast %cst_23 : f32 to vector<128x1xf32>
      %36 = arith.mulf %34, %35 : vector<128x1xf32>
      %cst_24 = arith.constant 9.99999974E-6 : f32
      %37 = vector.broadcast %cst_24 : f32 to vector<128x1xf32>
      %38 = arith.addf %36, %37 : vector<128x1xf32>
      %39 = math.rsqrt %38 : vector<128x1xf32>
      %40 = vector.broadcast %39 : vector<128x1xf32> to vector<128x128xf32>
      %41 = arith.mulf %31, %40 : vector<128x128xf32>
      %c0_25 = arith.constant 0 : index
      %c0_26 = arith.constant 0 : index
      %42 = vector.load %arg7[%c0_25, %c0_26] : memref<1x128xf32, #tpu.memory_space<vmem>>, vector<1x128xf32>
      %43 = vector.broadcast %42 : vector<1x128xf32> to vector<128x128xf32>
      %44 = arith.mulf %41, %43 : vector<128x128xf32>
      %c0_27 = arith.constant 0 : index
      %c0_28 = arith.constant 0 : index
      %45 = vector.load %arg8[%c0_27, %c0_28] : memref<1x128xf32, #tpu.memory_space<vmem>>, vector<1x128xf32>
      %46 = vector.broadcast %45 : vector<1x128xf32> to vector<128x128xf32>
      %47 = arith.addf %44, %46 : vector<128x128xf32>
      %c0_29 = arith.constant 0 : index
      %c0_30 = arith.constant 0 : index
      %48 = vector.load %arg9[%c0_29, %c0_30] : memref<128x128xf32, #tpu.memory_space<vmem>>, vector<128x128xf32>
      tpu.vector_store %arg9[%c0_29, %c0_30], %47 {strides = array<i32>} : memref<128x128xf32, #tpu.memory_space<vmem>>, vector<128x128xf32>,
    } else {
    }
    return
  }
  func.func @transform_0(%arg0: i32, %arg1: i32) -> (i32, i32) {
    %c0_i32 = arith.constant 0 : i32
    %c0_i32_0 = arith.constant 0 : i32
    return %arg0, %c0_i32 : i32, i32
  }
  func.func @transform_1(%arg0: i32, %arg1: i32) -> (i32, i32) {
    %c0_i32 = arith.constant 0 : i32
    %c0_i32_0 = arith.constant 0 : i32
    return %c0_i32, %arg1 : i32, i32
  }
  func.func @transform_2(%arg0: i32, %arg1: i32) -> (i32, i32) {
    %c0_i32 = arith.constant 0 : i32
    %c0_i32_0 = arith.constant 0 : i32
    return %c0_i32, %arg1 : i32, i32
  }
  func.func @transform_3(%arg0: i32, %arg1: i32) -> (i32, i32) {
    %c0_i32 = arith.constant 0 : i32
    %c0_i32_0 = arith.constant 0 : i32
    return %arg1, %c0_i32 : i32, i32
  }
  func.func @transform_4(%arg0: i32, %arg1: i32) -> (i32, i32) {
    %c0_i32 = arith.constant 0 : i32
    %c0_i32_0 = arith.constant 0 : i32
    %c0_i32_1 = arith.constant 0 : i32
    return %c0_i32, %c0_i32_0 : i32, i32
  }
  func.func @transform_5(%arg0: i32, %arg1: i32) -> (i32, i32) {
    %c0_i32 = arith.constant 0 : i32
    %c0_i32_0 = arith.constant 0 : i32
    %c0_i32_1 = arith.constant 0 : i32
    return %c0_i32, %c0_i32_0 : i32, i32
  }
  func.func @transform_6(%arg0: i32, %arg1: i32) -> (i32, i32) {
    %c0_i32 = arith.constant 0 : i32
    %c0_i32_0 = arith.constant 0 : i32
    %c0_i32_1 = arith.constant 0 : i32
    return %c0_i32, %c0_i32_0 : i32, i32
  }
  func.func @transform_7(%arg0: i32, %arg1: i32) -> (i32, i32) {
    %c0_i32 = arith.constant 0 : i32
    %c0_i32_0 = arith.constant 0 : i32
    return %arg0, %c0_i32 : i32, i32
  }
}

</mosaic_0001>

<bundles_post_ra>
// kernel: tpu_custom_call.1
= control target key start
LH: loop header
LB: loop body
LE: loop exit
PB: predicated region body
PF: predicated region fallthrough
CT: control target
= control target key end

     0   :  { %s2715_s0 = inlined_call_operand.hbm [shape: f32[256,128], index: 0, kind: input, shape index: {}]   ;;  %s2716_s1 = inlined_call_operand.hbm [shape: f32[128,512], index: 1, kind: input, shape index: {}]   ;;  %s2717_s2 = inlined_call_operand.vmem [shape: f32[1,512], index: 2, kind: input, shape index: {}]   ;;  %s2718_s3 = inlined_call_operand.hbm [shape: f32[512,128], index: 3, kind: input, shape index: {}]   ;;  %s2719_s4 = inlined_call_operand.vmem [shape: f32[1,128], index: 4, kind: input, shape index: {}]   ;;  %s2720_s5 = inlined_call_operand.vmem [shape: f32[1,128], index: 5, kind: input, shape index: {}]   ;;  %s2721_s6 = inlined_call_operand.vmem [shape: f32[1,128], index: 6, kind: input, shape index: {}]   ;;  %s2722_s7 = inlined_call_operand.hbm [shape: f32[256,128], index: 7, kind: output, shape index: {}]  }
   0x1   :  { %2735 = sst [smem:[#allocation21_spill]] %s2716_s1 }
   0x2   :  { %2736 = sst [smem:[#allocation22_spill]] %s2719_s4 }
   0x3   :  { %2737 = sst [smem:[#allocation23_spill]] %s2720_s5 }
   0x4   :  { %2738 = sst [smem:[#allocation24_spill]] %s2721_s6 }
   0x5   :  { %2739 = sst [smem:[#allocation25_spill]] %s2722_s7 }
   0x6   :  { %12 = vsyncpa [#allocation4], 0 }
   0x7   :  { %14 = vsyncpa [#allocation4 + $0x1], 0 }
   0x8   :  { %15 = vsyncpa [#allocation7], 0 }
   0x9   :  { %17 = vsyncpa [#allocation7 + $0x1], 0 }
   0xa   :  { %18 = vsyncpa [#allocation5], 0 }
   0xb   :  { %20 = vsyncpa [#allocation5 + $0x1], 0  ;;  %s1955_s24 = smov 0   ;;  %s1957_s25 = smov 0  }
   0xc   :  { %s1959_s26 = smov 0   ;;  %s1961_s27 = smov 0  }
   0xd   :  { %s1963_s28 = smov 0   ;;  %s1965_s29 = smov 0  }
   0xe   :  { %s1967_s30 = smov 0   ;;  %s1969_s8 = smov 0  }
   0xf   :  { %s1971_s9 = smov 0   ;;  %s1973_s10 = smov 0  }
  0x10   :  { %s1975_s11 = smov 0  }
  0x11 LB: > { %2740 = sst [smem:[#allocation13_spill]] %s1868_s26  ;;  %s35_s12 = sadd.s32 1, %s1892_s9  ;;  %s1900_s11 = sphi %s1975_s11, %s26_s11   ;;  %s1896_s10 = sphi %s1973_s10, %s2780_s10   ;;  %s1892_s9 = sphi %s1971_s9, %s2786_s9   ;;  %s1888_s8 = sphi %s1969_s8, %s2778_s8   ;;  %s1884_s30 = sphi %s1967_s30, %s2785_s30   ;;  %s1880_s29 = sphi %s1965_s29, %s2777_s29   ;;  %s1876_s28 = sphi %s1963_s28, %s2784_s28   ;;  %s1872_s27 = sphi %s1961_s27, %s2783_s27   ;;  %s1868_s26 = sphi %s1959_s26, %s2775_s26   ;;  %s1864_s25 = sphi %s1957_s25, %s2782_s25   ;;  %s1860_s24 = sphi %s1955_s24, %s2781_s24  }
  0x12   : > { %2741 = sst [smem:[#allocation14_spill]] %s1880_s29  ;;  %p2726_p0 = scmp.eq.s32.totalorder %s1900_s11, 0 }
  0x13   : > { %2742 = sst [smem:[#allocation15_spill]] %s1888_s8  ;;  %p2012_p1 = scmp.ge.s32.totalorder %s35_s12, 2 }
  0x14   : > { %2743 = sst [smem:[#allocation16_spill]] %s1896_s10  ;;  %s71_s14 = sadd.s32 1, %s1868_s26 }
  0x15   : > { %p78_p2 = scmp.ne.s32.totalorder %s1868_s26, %s1864_s25  ;;  %s2788_s12 = smov (%p2012_p1, %s35_s12), 0 }
  0x16   : > { %2745 = sst [smem:[#allocation17_spill]] %s2788_s12  ;;  %s68_s15 = ssub.s32 %s1892_s9, %s2788_s12 }
  0x17   : > { %p80_p4 = por %p78_p2, %p2726_p0  ;;  %p2725_p5 = scmp.lt.s32.totalorder %s1900_s11, 4 }
  0x18   : > { %p69_p6 = scmp.eq.s32.totalorder %s68_s15, 0  ;;  %s279_s16 = sand.u32 1, %s1900_s11  }
  0x19   : > { %s281_s17 = sand.u32 1, %s1868_s26   ;;  %s1384_s20 = sshll.u32 %s1892_s9, 8 }
  0x1a   : > { %s2033_s18 = scalar_select %p69_p6, %s1868_s26, %s71_s14  }
  0x1b   : > { %s2035_s19 = sshll.u32 %s281_s17, 8  ;;  %s2747_s1 = sld [smem:[#allocation21_spill]] }
  0x1c   : > { %2746 = sst [smem:[#allocation18_spill]] %s2033_s18  ;;  %s283_s12 = scalar_lea.vmem [#allocation6], %s2035_s19 }
  0x1d   : > { %s290_s7 = sshll.u32 %s283_s12, 4  ;;  %p2046_p7 = pnand %p2725_p5, %p80_p4  ;;  %s2050_s7 = int_to_ptr.vmem [resolvable:$true] %s290_s7 }
  0x1e   : > { %s2053_s14 = scalar_lea.sflag [#allocation7], %s279_s16 }
  0x1f   : > { %p2727_p10 = pneg %p2046_p7 }
  0x21   : > { %s2041_s23 = scalar_lea.hbm %s2747_s1, %s1384_s20  ;;  %s1689_s21 = scalar_lea.hbm %s2747_s1, 8192 }
  0x22   : > { %s1684_s17 = scalar_lea.hbm %s2041_s23, 4096  ;;  %p1690_p13 = scmp.lt.u32.totalorder %s2041_s23, %s2747_s1 }
  0x23   : > { %p1685_p9 = scmp.ne.s32.totalorder %s2041_s23, %s1684_s17  ;;  %p1691_p2 = scmp.lt.u32.totalorder %s1689_s21, %s1684_s17 }
  0x24   : > { %p1693_p6 = scmp.lt.u32.totalorder %s1684_s17, %s2041_s23 }
  0x25   : > { %p1687_p11 = pnand %p2727_p10, %p1685_p9  ;;  %p1692_p4 = por %p1691_p2, %p1690_p13 }
  0x27   : > { %p1688_p12 = pneg %p1687_p11  ;;  %p1694_p5 = por %p1693_p6, %p1692_p4 }
  0x29   : > { %p1695_p3 = pnand %p1694_p5, %p1688_p12 }
  0x2b   : > { %1698 = shalt.err (!%p1695_p3)
}
  0x2c   : > { %s1699_s16 = scalar_lea.vmem %s2050_s7, 4096  ;;  %s1902_s12 = smov [#allocation6]  }
  0x2d   : > { %p1700_p9 = scmp.ne.s32.totalorder %s2050_s7, %s1699_s16  ;;  %s1704_s20 = sshll.u32 %s1902_s12, 4  ;;  %s1705_s20 = int_to_ptr.vmem [resolvable:$false] %s1704_s20 }
  0x2e   : > { %s1706_s18 = scalar_lea.vmem %s1705_s20, 8192  ;;  %p1707_p8 = scmp.lt.s32.totalorder %s2050_s7, %s1705_s20 }
  0x2f   : > { %p1702_p11 = pnand %p1700_p9, %p2727_p10  ;;  %p1708_p13 = scmp.lt.s32.totalorder %s1706_s18, %s1699_s16 }
  0x31   : > { %p1703_p0 = pneg %p1702_p11  ;;  %p1709_p2 = por %p1708_p13, %p1707_p8 }
  0x33   : > { %p1710_p4 = pnand %p1709_p2, %p1703_p0 }
  0x35   : > { %1713 = shalt.err (!%p1710_p4)
}
  0x36   : > { %s1903_s17 = smov 512   ;;  %s1904_s21 = smov 256  }
  0x37   : > { %s1905_s22 = smov 16   ;;  %p327_p0 = scmp.lt.s32.totalorder %s1900_s11, 5 }
  0x38   : > { %1545 = dma.hbm_to_vmem [thread:$0]  (!%p2046_p7), %s2041_s23, 4096, %s2050_s7, %s2053_s14, %s1903_s17, %s1904_s21, %s1905_s22  }
  0x39   : > { %p2749_p3 = scmp.ge.s32.totalorder %s1900_s11, 1  ;;  %s2089_s12 = sadd.s32 4294967295, %s1900_s11  }
  0x3a   : > { %s1355_s20 = sadd.s32 4294967294, %s1900_s11   ;;  %s38_s18 = sadd.s32 1, %s1896_s10 }
  0x3b   : > { %p2084_p5 = pnand %p2749_p3, %p327_p0  ;;  %s45_s1 = sadd.s32 1, %s1880_s29 }
  0x3c   : > { %s2790_s18 = smov (!%p2012_p1, %s38_s18), %s1896_s10  ;;  %p52_p8 = scmp.ne.s32.totalorder %s1880_s29, %s1876_s28 }
  0x3d   : > { %s2750_s16 = scalar_select %p2084_p5, 1, 0 }
  0x3e   : > { %p58_p12 = scmp.ne.s32.totalorder %s1876_s28, %s1872_s27  ;;  %p40_p6 = scmp.ge.s32.totalorder %s2790_s18, 2 }
  0x3f   : > { %p59_p9 = scmp.eq.s32.totalorder %s2089_s12, 0  ;;  %p2751_p11 = scmp.eq.s32.totalorder %s1900_s11, 0 }
  0x40   : > { %p223_p2 = scmp.eq.s32.totalorder %s2089_s12, 3  ;;  %s2792_s18 = smov (%p40_p6, %s2790_s18), 0 }
  0x41   : > { %p2104_p13 = por %p2751_p11, %p52_p8  ;;  %2753 = sst [smem:[#allocation19_spill]] %s2792_s18 }
  0x42   : > { %p2114_p1 = por %p59_p9, %p58_p12  ;;  %p2755_p4 = scmp.ne.s32.totalorder %s1864_s25, %s1860_s24 }
  0x43   : > { %s42_s17 = ssub.s32 %s1896_s10, %s2792_s18  ;;  %p2127_p3 = por %p223_p2, %p52_p8 }
  0x44   : > { %s2754_s13 = scalar_select %p2114_p1, 1, 0 }
  0x45   : > { %p2121_p0 = por %p2755_p4, %p59_p9  ;;  %p43_p11 = scmp.eq.s32.totalorder %s42_s17, 0 }
  0x46   : > { %s2757_s21 = scalar_select %p2127_p3, 1, 0 }
  0x47   : > { %s2756_s23 = scalar_select %p2121_p0, 1, 0 }
  0x48   : > { %p229_p10 = scmp.eq.s32.totalorder %s1355_s20, 3  ;;  %s258_s22 = sand.u32 1, %s1880_s29  }
  0x49   : > { %s1383_s26 = sshll.u32 %s1896_s10, 11  ;;  %s1358_s24 = sshll.u32 %s258_s22, 7 }
  0x4a   : > { %s2134_s8 = scalar_select %p43_p11, %s1880_s29, %s45_s1  }
  0x4b   : > { %p2139_p6 = por %p229_p10, %p58_p12  ;;  %s2146_s18 = scalar_lea.hbm %s2715_s0, %s1383_s26 }
  0x4c   : > { %2758 = sst [smem:[#allocation20_spill]] %s2134_s8  ;;  %p2760_p8 = scmp.lt.s32.totalorder %s1900_s11, 4 }
  0x4d   : > { %s2759_s6 = scalar_select %p2139_p6, 1, 0 }
  0x4e   : > { %p2152_p9 = pnand %p2760_p8, %p2104_p13  ;;  %s262_s20 = scalar_lea.vmem [#allocation3], %s1358_s24 }
  0x4f   : > { %s269_s17 = sshll.u32 %s262_s20, 4  ;;  %s2158_s10 = scalar_lea.sflag [#allocation4], %s258_s22  ;;  %s2156_s17 = int_to_ptr.vmem [resolvable:$true] %s269_s17 }
  0x50   : > { %s1714_s4 = scalar_lea.hbm %s2146_s18, 2048  ;;  %p1716_p12 = pneg %p2152_p9 }
  0x51   : > { %p1715_p10 = scmp.ne.s32.totalorder %s2146_s18, %s1714_s4  ;;  %s1719_s7 = scalar_lea.hbm %s2715_s0, 4096 }
  0x52   : > { %p1720_p13 = scmp.lt.u32.totalorder %s2146_s18, %s2715_s0  ;;  %p1721_p11 = scmp.lt.u32.totalorder %s1719_s7, %s1714_s4 }
  0x53   : > { %p1717_p2 = pnand %p1716_p12, %p1715_p10  ;;  %p1723_p6 = scmp.lt.u32.totalorder %s1714_s4, %s2146_s18 }
  0x54   : > { %p1722_p8 = por %p1721_p11, %p1720_p13 }
  0x55   : > { %p1718_p4 = pneg %p1717_p2 }
  0x56   : > { %p1724_p3 = por %p1723_p6, %p1722_p8 }
  0x58   : > { %p1725_p0 = pnand %p1724_p3, %p1718_p4 }
  0x5a   : > { %1728 = shalt.err (!%p1725_p0)
}
  0x5b   : > { %s1729_s22 = scalar_lea.vmem %s2156_s17, 2048  ;;  %s1906_s24 = smov [#allocation3]  }
  0x5c   : > { %p1730_p10 = scmp.ne.s32.totalorder %s2156_s17, %s1729_s22  ;;  %s1734_s20 = sshll.u32 %s1906_s24, 4  ;;  %s1735_s20 = int_to_ptr.vmem [resolvable:$false] %s1734_s20 }
  0x5d   : > { %s1736_s29 = scalar_lea.vmem %s1735_s20, 4096  ;;  %p1737_p5 = scmp.lt.s32.totalorder %s2156_s17, %s1735_s20 }
  0x5e   : > { %p1732_p2 = pnand %p1730_p10, %p1716_p12  ;;  %p1738_p13 = scmp.lt.s32.totalorder %s1736_s29, %s1729_s22 }
  0x60   : > { %p1733_p1 = pneg %p1732_p2  ;;  %p1739_p11 = por %p1738_p13, %p1737_p5 }
  0x62   : > { %p1740_p6 = pnand %p1739_p11, %p1733_p1 }
  0x64   : > { %1743 = shalt.err (!%p1740_p6)
}
  0x65   : > { %s1907_s8 = smov 128   ;;  %s1908_s4 = smov 8  }
  0x66   : > { %1542 = dma.hbm_to_vmem [thread:$0]  (!%p2152_p9), %s2146_s18, 2048, %s2156_s17, %s2158_s10, %s1907_s8, %s1907_s8, %s1908_s4  }
  0x67   : > { %s1385_s5 = sshll.u32 %s1892_s9, 12  ;;  %s312_s26 = scalar_lea.vmem [#allocation8], %s2035_s19 }
  0x68   : > { %s319_s7 = sshll.u32 %s312_s26, 4  ;;  %s2194_s20 = scalar_lea.hbm %s2718_s3, %s1385_s5  ;;  %s2196_s7 = int_to_ptr.vmem [resolvable:$true] %s319_s7 }
  0x69   : > { %s1744_s29 = scalar_lea.hbm %s2194_s20, 4096  ;;  %p2762_p1 = pneg %p2046_p7 }
  0x6a   : > { %p1745_p5 = scmp.ne.s32.totalorder %s2194_s20, %s1744_s29  ;;  %s1749_s18 = scalar_lea.hbm %s2718_s3, 8192 }
  0x6b   : > { %p1750_p9 = scmp.lt.u32.totalorder %s2194_s20, %s2718_s3  ;;  %p1751_p12 = scmp.lt.u32.totalorder %s1749_s18, %s1744_s29 }
  0x6c   : > { %p1747_p0 = pnand %p1745_p5, %p2762_p1  ;;  %p1753_p8 = scmp.lt.u32.totalorder %s1744_s29, %s2194_s20 }
  0x6d   : > { %p1752_p4 = por %p1751_p12, %p1750_p9 }
  0x6e   : > { %p1748_p3 = pneg %p1747_p0 }
  0x6f   : > { %p1754_p10 = por %p1753_p8, %p1752_p4 }
  0x71   : > { %p1755_p2 = pnand %p1754_p10, %p1748_p3 }
  0x73   : > { %1758 = shalt.err (!%p1755_p2)
}
  0x74   : > { %s1759_s5 = scalar_lea.vmem %s2196_s7, 4096  ;;  %p2763_p11 = pmov %p2762_p1 }
  0x75   : > { %p1760_p13 = scmp.ne.s32.totalorder %s2196_s7, %s1759_s5  ;;  %s1909_s26 = smov [#allocation8]  }
  0x76   : > { %s1764_s22 = sshll.u32 %s1909_s26, 4  ;;  %s1765_s22 = int_to_ptr.vmem [resolvable:$false] %s1764_s22 }
  0x77   : > { %p1762_p6 = pnand %p1760_p13, %p2763_p11  ;;  %s1766_s24 = scalar_lea.vmem %s1765_s22, 8192 }
  0x78   : > { %p1767_p1 = scmp.lt.s32.totalorder %s2196_s7, %s1765_s22  ;;  %p1768_p0 = scmp.lt.s32.totalorder %s1766_s24, %s1759_s5 }
  0x79   : > { %p1763_p5 = pneg %p1762_p6 }
  0x7a   : > { %p1769_p9 = por %p1768_p0, %p1767_p1 }
  0x7c   : > { %p1770_p12 = pnand %p1769_p9, %p1763_p5 }
  0x7e   : > { %1773 = shalt.err (!%p1770_p12)
}
  0x7f   : > { %1548 = dma.hbm_to_vmem [thread:$0]  (!%p2046_p7), %s2194_s20, 4096, %s2196_s7, %s2053_s14, %s1907_s8, %s1907_s8, %s1908_s4  }
  0x80   : > { %p2764_p3 = scmp.ne.s32.totalorder %s2750_s16, 0 }
  0x81   : > { %s2228_s29 = sand.u32 (!%p2764_p3), 1, %s1876_s28   ;;  %p2765_p4 = scmp.ne.s32.totalorder (!%p2764_p3), %s2754_s13, 0 }
  0x82   : > { %331 = sbr.rel (%p2764_p3) target bundleno = 1037 (0x40d), region = 48  ;;  %s1368_s10 = sshll.u32 (!%p2764_p3), %s2228_s29, 7 }
  0x83   : > { %s334_s19 = scalar_lea.sflag (!%p2764_p3), [#allocation4], %s2228_s29  ;;  %s2232_s18 = scalar_lea.vmem (!%p2764_p3), [#allocation3], %s1368_s10 }
  0x89   : > { %1847 = dma.done.wait (%p2765_p4), %s334_s19, 2048  }
  0x8a   : > { %1849 = vsyncadd (%p2765_p4), %s334_s19, 4294965248  ;;  %s342_s15 = sand.u32 1, %s2089_s12   ;;  %s344_s14 = sand.u32 1, %s1864_s25  }
  0x8b   : > { %s1369_s16 = sshll.u32 %s344_s14, 8  ;;  %s343_s8 = scalar_lea.sflag [#allocation7], %s342_s15 }
  0x8c   : > { %s2240_s4 = scalar_lea.vmem [#allocation6], %s1369_s16  ;;  %p2766_p7 = scmp.ne.s32.totalorder %s2756_s23, 0 }
  0x8e   : > { %1851 = dma.done.wait (%p2766_p7), %s343_s8, 8192  }
  0x8f   : > { %1853 = vsyncadd (%p2766_p7), %s343_s8, 4294959104  ;;  %s1372_s7 = sshll.u32 %s1884_s30, 1  ;;  %s2253_s1 = scalar_lea.vmem [#allocation8], %s1369_s16 }
  0x90   : > { %p403_p8 = scmp.lt.s32.totalorder %s1372_s7, 3  ;;  %s2255_s17 = scalar_lea.vmem [#allocation9], %s1368_s10 }
  0x91   : > { %p1373_p10 = scmp.ne.s32.totalorder %s1884_s30, 0 }
  0x92   : > { %s2794_s7 = smov (!%p403_p8, %s1372_s7), 3  ;;  %v1910_v0 = vmov (!%p1373_p10), 0.0  }
  0x93   : > { %s405_s12 = scalar_lea.vmem %s2717_s2, %s2794_s7  ;;  %412 = sbr.rel (%p1373_p10) target bundleno = 155 (0x9b), region = 64  ;;  %413 = vst [vmem:[#allocation2] sm:$0xff] (!%p1373_p10), %v1910_v0  ;;  %414 = vst [vmem:[#allocation2 + $0x8] sm:$0xff] (!%p1373_p10), %v1910_v0 }
  0x94   : > { %415 = vst [vmem:[#allocation2 + $0x10] sm:$0xff] (!%p1373_p10), %v1910_v0  ;;  %416 = vst [vmem:[#allocation2 + $0x18] sm:$0xff] (!%p1373_p10), %v1910_v0 }
  0x95   : > { %417 = vst [vmem:[#allocation2 + $0x20] sm:$0xff] (!%p1373_p10), %v1910_v0  ;;  %418 = vst [vmem:[#allocation2 + $0x28] sm:$0xff] (!%p1373_p10), %v1910_v0 }
  0x96   : > { %419 = vst [vmem:[#allocation2 + $0x30] sm:$0xff] (!%p1373_p10), %v1910_v0  ;;  %420 = vst [vmem:[#allocation2 + $0x38] sm:$0xff] (!%p1373_p10), %v1910_v0 }
  0x97   : > { %421 = vst [vmem:[#allocation2 + $0x40] sm:$0xff] (!%p1373_p10), %v1910_v0  ;;  %422 = vst [vmem:[#allocation2 + $0x48] sm:$0xff] (!%p1373_p10), %v1910_v0 }
  0x98   : > { %423 = vst [vmem:[#allocation2 + $0x50] sm:$0xff] (!%p1373_p10), %v1910_v0  ;;  %424 = vst [vmem:[#allocation2 + $0x58] sm:$0xff] (!%p1373_p10), %v1910_v0 }
  0x99   : > { %425 = vst [vmem:[#allocation2 + $0x60] sm:$0xff] (!%p1373_p10), %v1910_v0  ;;  %426 = vst [vmem:[#allocation2 + $0x68] sm:$0xff] (!%p1373_p10), %v1910_v0 }
  0x9a   : > { %427 = vst [vmem:[#allocation2 + $0x70] sm:$0xff] %v1910_v0  ;;  %428 = vst [vmem:[#allocation2 + $0x78] sm:$0xff] %v1910_v0 }
  0x9b PF: > { %v446_v1 = vld [vmem:[%s2240_s4 + $0x8] sm:$0xff]  ;;  %v448_v2 = vld [vmem:[%s2240_s4 + $0x18] sm:$0xff]  ;;  %v445_v3 = vld [vmem:[%s2240_s4] sm:$0xff]  ;;  %v1911_v8 = vmov 0.0   ;;  %p1374_p2 = scmp.ne.s32.totalorder %s1884_s30, 1 }
  0x9c   : > { %v1467_v4 = vpack.c.bf16 %v448_v2, %v446_v1  ;;  %v447_v5 = vld [vmem:[%s2240_s4 + $0x10] sm:$0xff]  ;;  %v450_v6 = vld [vmem:[%s2240_s4 + $0x28] sm:$0xff]  ;;  %v452_v7 = vld [vmem:[%s2240_s4 + $0x38] sm:$0xff]  ;;  %553 = vmatprep.mubr.f32.mxu0 %v1911_v8  ;;  %s2767_s24 = sld [smem:[#allocation22_spill]] (!%p1374_p2)  ;;  %s2768_s19 = sld [smem:[#allocation23_spill]] (!%p1374_p2) }
  0x9d   : > { %v1469_v9 = vpack.c.bf16 %v447_v5, %v445_v3  ;;  %v1471_v10 = vpack.c.bf16 %v452_v7, %v450_v6  ;;  %v449_v11 = vld [vmem:[%s2240_s4 + $0x20] sm:$0xff]  ;;  %v451_v12 = vld [vmem:[%s2240_s4 + $0x30] sm:$0xff]  ;;  %v454_v13 = vld [vmem:[%s2240_s4 + $0x48] sm:$0xff]  ;;  %s2769_s14 = sld [smem:[#allocation24_spill]] (!%p1374_p2) }
  0x9e   : > { %1468 = vmatprep.subr.bf16.mxu0 %v1467_v4  ;;  %v456_v14 = vld [vmem:[%s2240_s4 + $0x58] sm:$0xff]  ;;  %v1473_v15 = vpack.c.bf16 %v451_v12, %v449_v11  ;;  %v453_v17 = vld [vmem:[%s2240_s4 + $0x40] sm:$0xff]  ;;  %v455_v18 = vld [vmem:[%s2240_s4 + $0x50] sm:$0xff] }
  0x9f   : > { %1470 = vmatpush1.bf16.msra.mxu0 %v1469_v9  ;;  %v1475_v16 = vpack.c.bf16 %v456_v14, %v454_v13  ;;  %v458_v19 = vld [vmem:[%s2240_s4 + $0x68] sm:$0xff]  ;;  %v460_v20 = vld [vmem:[%s2240_s4 + $0x78] sm:$0xff]  ;;  %v1477_v21 = vpack.c.bf16 %v455_v18, %v453_v17  ;;  %v457_v23 = vld [vmem:[%s2240_s4 + $0x60] sm:$0xff] }
  0xa0   : > { %1472 = vmatprep.subr.bf16.mxu0 %v1471_v10  ;;  %v1479_v22 = vpack.c.bf16 %v460_v20, %v458_v19  ;;  %v459_v24 = vld [vmem:[%s2240_s4 + $0x70] sm:$0xff]  ;;  %v462_v25 = vld [vmem:[%s2240_s4 + $0x88] sm:$0xff]  ;;  %v464_v26 = vld [vmem:[%s2240_s4 + $0x98] sm:$0xff] }
  0xa1   : > { %v1481_v27 = vpack.c.bf16 %v459_v24, %v457_v23  ;;  %v1483_v28 = vpack.c.bf16 %v464_v26, %v462_v25  ;;  %v461_v29 = vld [vmem:[%s2240_s4 + $0x80] sm:$0xff]  ;;  %v463_v30 = vld [vmem:[%s2240_s4 + $0x90] sm:$0xff]  ;;  %v466_v31 = vld [vmem:[%s2240_s4 + $0xa8] sm:$0xff] }
  0xa2   : > { %v468_v32 = vld [vmem:[%s2240_s4 + $0xb8] sm:$0xff]  ;;  %v465_v33 = vld [vmem:[%s2240_s4 + $0xa0] sm:$0xff]  ;;  %v467_v34 = vld [vmem:[%s2240_s4 + $0xb0] sm:$0xff]  ;;  %v1485_v35 = vpack.c.bf16 %v463_v30, %v461_v29 }
  0xa3   : > { %1474 = vmatpush1.bf16.msra.mxu0 %v1473_v15  ;;  %v470_v36 = vld [vmem:[%s2240_s4 + $0xc8] sm:$0xff]  ;;  %v472_v37 = vld [vmem:[%s2240_s4 + $0xd8] sm:$0xff]  ;;  %v714_v38 = vld [vmem:[%s2253_s1 + $0x80] sm:$0xff]  ;;  %v1487_v41 = vpack.c.bf16 %v468_v32, %v466_v31  ;;  %v1489_v52 = vpack.c.bf16 %v467_v34, %v465_v33 }
  0xa4   : > { %1476 = vmatprep.subr.bf16.mxu0 %v1475_v16  ;;  %v715_v39 = vld [vmem:[%s2253_s1 + $0x88] sm:$0xff]  ;;  %v698_v40 = vld [vmem:[%s2253_s1] sm:$0xff]  ;;  %v716_v44 = vld [vmem:[%s2253_s1 + $0x90] sm:$0xff]  ;;  %v1491_v56 = vpack.c.bf16 %v472_v37, %v470_v36 }
  0xa5   : > { %v1499_v42 = vpack.c.bf16 %v715_v39, %v714_v38  ;;  %v699_v43 = vld [vmem:[%s2253_s1 + $0x8] sm:$0xff]  ;;  %v717_v45 = vld [vmem:[%s2253_s1 + $0x98] sm:$0xff]  ;;  %v700_v48 = vld [vmem:[%s2253_s1 + $0x10] sm:$0xff] }
  0xa6   : > { %v1501_v46 = vpack.c.bf16 %v699_v43, %v698_v40  ;;  %v1503_v47 = vpack.c.bf16 %v717_v45, %v716_v44  ;;  %v701_v49 = vld [vmem:[%s2253_s1 + $0x18] sm:$0xff]  ;;  %v718_v50 = vld [vmem:[%s2253_s1 + $0xa0] sm:$0xff]  ;;  %v719_v51 = vld [vmem:[%s2253_s1 + $0xa8] sm:$0xff] }
  0xa7   : > { %1478 = vmatpush1.bf16.msra.mxu0 %v1477_v21  ;;  %1500 = vmatprep.subr.bf16.mxu1 %v1499_v42  ;;  %v469_v53 = vld [vmem:[%s2240_s4 + $0xc0] sm:$0xff]  ;;  %v471_v54 = vld [vmem:[%s2240_s4 + $0xd0] sm:$0xff]  ;;  %v1505_v55 = vpack.c.bf16 %v701_v49, %v700_v48  ;;  %v474_v57 = vld [vmem:[%s2240_s4 + $0xe8] sm:$0xff]  ;;  %v1507_v58 = vpack.c.bf16 %v719_v51, %v718_v50  ;;  %v479_v51 = vlaneseq }
  0xa8   : > { %1480 = vmatprep.subr.bf16.mxu0 %v1479_v22  ;;  %1502 = vmatpush3.bf16.msra.mxu1 %v1501_v46  ;;  %v702_v59 = vld [vmem:[%s2253_s1 + $0x20] sm:$0xff]  ;;  %v703_v60 = vld [vmem:[%s2253_s1 + $0x28] sm:$0xff]  ;;  %v476_v61 = vld [vmem:[%s2240_s4 + $0xf8] sm:$0xff]  ;;  %v1493_v0 = vpack.c.bf16 %v471_v54, %v469_v53 }
  0xa9   : > { %1504 = vmatprep.subr.bf16.mxu1 %v1503_v47  ;;  %v720_v62 = vld [vmem:[%s2253_s1 + $0xb0] sm:$0xff]  ;;  %v721_v63 = vld [vmem:[%s2253_s1 + $0xb8] sm:$0xff]  ;;  %v473_v1 = vld [vmem:[%s2240_s4 + $0xe0] sm:$0xff]  ;;  %v1509_v2 = vpack.c.bf16 %v703_v60, %v702_v59  ;;  %v1495_v3 = vpack.c.bf16 %v476_v61, %v474_v57 }
  0xaa   : > { %v475_v4 = vld [vmem:[%s2240_s4 + $0xf0] sm:$0xff]  ;;  %v1511_v5 = vpack.c.bf16 %v721_v63, %v720_v62  ;;  %v705_v7 = vld [vmem:[%s2253_s1 + $0x38] sm:$0xff]  ;;  %v722_v9 = vld [vmem:[%s2253_s1 + $0xc0] sm:$0xff] }
  0xab   : > { %1482 = vmatpush1.bf16.msra.mxu0 %v1481_v27  ;;  %v704_v6 = vld [vmem:[%s2253_s1 + $0x30] sm:$0xff]  ;;  %v723_v10 = vld [vmem:[%s2253_s1 + $0xc8] sm:$0xff]  ;;  %v1497_v11 = vpack.c.bf16 %v475_v4, %v473_v1  ;;  %v706_v14 = vld [vmem:[%s2253_s1 + $0x40] sm:$0xff] }
  0xac   : > { %1484 = vmatprep.subr.bf16.mxu0 %v1483_v28  ;;  %1506 = vmatpush3.bf16.msra.mxu1 %v1505_v55  ;;  %v1513_v12 = vpack.c.bf16 %v705_v7, %v704_v6  ;;  %v1515_v13 = vpack.c.bf16 %v723_v10, %v722_v9  ;;  %v707_v15 = vld [vmem:[%s2253_s1 + $0x48] sm:$0xff]  ;;  %v724_v16 = vld [vmem:[%s2253_s1 + $0xd0] sm:$0xff]  ;;  %v725_v17 = vld [vmem:[%s2253_s1 + $0xd8] sm:$0xff] }
  0xad   : > { %1508 = vmatprep.subr.bf16.mxu1 %v1507_v58  ;;  %v2314_v18 = vld [vmem:[%s2232_s18] sm:$0xff]  ;;  %v1517_v19 = vpack.c.bf16 %v707_v15, %v706_v14  ;;  %v1519_v20 = vpack.c.bf16 %v725_v17, %v724_v16  ;;  %v708_v21 = vld [vmem:[%s2253_s1 + $0x50] sm:$0xff]  ;;  %v709_v22 = vld [vmem:[%s2253_s1 + $0x58] sm:$0xff] }
  0xae   : > { %v726_v23 = vld [vmem:[%s2253_s1 + $0xe0] sm:$0xff]  ;;  %v727_v24 = vld [vmem:[%s2253_s1 + $0xe8] sm:$0xff]  ;;  %v1521_v26 = vpack.c.bf16 %v709_v22, %v708_v21  ;;  %v2328_v28 = vld [vmem:[%s2232_s18 + $0x10] sm:$0xff] }
  0xaf   : > { %1486 = vmatpush1.bf16.msra.mxu0 %v1485_v35  ;;  %v2323_v25 = vld [vmem:[%s2232_s18 + $0x8] sm:$0xff]  ;;  %v1523_v27 = vpack.c.bf16 %v727_v24, %v726_v23  ;;  %v2333_v29 = vld [vmem:[%s2232_s18 + $0x18] sm:$0xff]  ;;  %v2338_v30 = vld [vmem:[%s2232_s18 + $0x20] sm:$0xff] }
  0xb0   : > { %1488 = vmatprep.subr.bf16.mxu0 %v1487_v41  ;;  %1510 = vmatpush3.bf16.msra.mxu1 %v1509_v2  ;;  %v2343_v31 = vld [vmem:[%s2232_s18 + $0x28] sm:$0xff]  ;;  %v2348_v32 = vld [vmem:[%s2232_s18 + $0x30] sm:$0xff]  ;;  %v2353_v33 = vld [vmem:[%s2232_s18 + $0x38] sm:$0xff] }
  0xb1   : > { %1512 = vmatprep.subr.bf16.mxu1 %v1511_v5  ;;  %v2358_v34 = vld [vmem:[%s2232_s18 + $0x40] sm:$0xff]  ;;  %v2363_v35 = vld [vmem:[%s2232_s18 + $0x48] sm:$0xff]  ;;  %v2368_v36 = vld [vmem:[%s2232_s18 + $0x50] sm:$0xff] }
  0xb2   : > { %v2373_v37 = vld [vmem:[%s2232_s18 + $0x58] sm:$0xff]  ;;  %v2378_v38 = vld [vmem:[%s2232_s18 + $0x60] sm:$0xff]  ;;  %v2383_v39 = vld [vmem:[%s2232_s18 + $0x68] sm:$0xff] }
  0xb3   : > { %1490 = vmatpush1.bf16.msra.mxu0 %v1489_v52  ;;  %v2388_v40 = vld [vmem:[%s2232_s18 + $0x70] sm:$0xff]  ;;  %v2393_v41 = vld [vmem:[%s2232_s18 + $0x78] sm:$0xff]  ;;  %v710_v42 = vld [vmem:[%s2253_s1 + $0x60] sm:$0xff]  ;;  %v480_v52 = vshrl.u32 %v479_v51, 7 }
  0xb4   : > { %1492 = vmatprep.subr.bf16.mxu0 %v1491_v56  ;;  %1514 = vmatpush3.bf16.msra.mxu1 %v1513_v12  ;;  %v711_v43 = vld [vmem:[%s2253_s1 + $0x68] sm:$0xff]  ;;  %v728_v45 = vld [vmem:[%s2253_s1 + $0xf0] sm:$0xff]  ;;  %v729_v46 = vld [vmem:[%s2253_s1 + $0xf8] sm:$0xff] }
  0xb5   : > { %1516 = vmatprep.subr.bf16.mxu1 %v1515_v13  ;;  %v1525_v44 = vpack.c.bf16 %v711_v43, %v710_v42  ;;  %v1527_v47 = vpack.c.bf16 %v729_v46, %v728_v45  ;;  %v712_v48 = vld [vmem:[%s2253_s1 + $0x70] sm:$0xff]  ;;  %v713_v49 = vld [vmem:[%s2253_s1 + $0x78] sm:$0xff]  ;;  %v477_v53 = vld [vmem:[%s405_s12] sm:$0x3]  ;;  %v485_v54 = vsub.s32 1, %v480_v52 }
  0xb6   : > { %v1529_v50 = vpack.c.bf16 %v713_v49, %v712_v48 }
  0xb7   : > { %1494 = vmatpush1.bf16.msra.mxu0 %v1493_v0  ;;  %v2409_v56 = vrot.slane %v477_v53, %v485_v54 }
  0xb8   : > { %1496 = vmatprep.subr.bf16.mxu0 %v1495_v3  ;;  %1518 = vmatpush3.bf16.msra.mxu1 %v1517_v19 }
  0xb9   : > { %1520 = vmatprep.subr.bf16.mxu1 %v1519_v20 }
  0xbb   : > { %1498 = vmatpush1.bf16.msra.mxu0 %v1497_v11 }
  0xbc   : > { %1522 = vmatpush3.bf16.msra.mxu1 %v1521_v26 }
  0xbd   : > { %1524 = vmatprep.subr.bf16.mxu1 %v1523_v27 }
  0xbe   : > { %554 = vmatmul.mubr.f32.vlgmr.msra.gmra.mrb[0].mxu0 %v2314_v18 }
  0xbf   : > { %559 = vmatprep.mubr.f32.mxu0 %v1911_v8 }
  0xc0   : > { %1526 = vmatpush3.bf16.msra.mxu1 %v1525_v44 }
  0xc1   : > { %1528 = vmatprep.subr.bf16.mxu1 %v1527_v47 }
  0xc2   : > { %560 = vmatmul.mubr.f32.gmra.mrb[2].mxu0 %v2323_v25 }
  0xc3   : > { %565 = vmatprep.mubr.f32.mxu0 %v1911_v8 }
  0xc4   : > { %1530 = vmatpush3.bf16.msra.mxu1 %v1529_v50 }
  0xc6   : > { %566 = vmatmul.mubr.f32.gmra.mrb[4].mxu0 %v2328_v28 }
  0xc7   : > { %571 = vmatprep.mubr.f32.mxu0 %v1911_v8 }
  0xca   : > { %572 = vmatmul.mubr.f32.gmra.mrb[6].mxu0 %v2333_v29 }
  0xcb   : > { %577 = vmatprep.mubr.f32.mxu0 %v1911_v8 }
  0xce   : > { %578 = vmatmul.mubr.f32.gmra.mrb[8].mxu0 %v2338_v30 }
  0xcf   : > { %583 = vmatprep.mubr.f32.mxu0 %v1911_v8 }
  0xd2   : > { %584 = vmatmul.mubr.f32.gmra.mrb[10].mxu0 %v2343_v31 }
  0xd3   : > { %589 = vmatprep.mubr.f32.mxu0 %v1911_v8 }
  0xd6   : > { %590 = vmatmul.mubr.f32.gmra.mrb[12].mxu0 %v2348_v32 }
  0xd7   : > { %595 = vmatprep.mubr.f32.mxu0 %v1911_v8 }
  0xda   : > { %596 = vmatmul.mubr.f32.gmra.mrb[14].mxu0 %v2353_v33 }
  0xdb   : > { %601 = vmatprep.mubr.f32.mxu0 %v1911_v8 }
  0xde   : > { %602 = vmatmul.mubr.f32.gmra.mrb[16].mxu0 %v2358_v34 }
  0xdf   : > { %607 = vmatprep.mubr.f32.mxu0 %v1911_v8 }
  0xe2   : > { %608 = vmatmul.mubr.f32.gmra.mrb[18].mxu0 %v2363_v35 }
  0xe3   : > { %613 = vmatprep.mubr.f32.mxu0 %v1911_v8 }
  0xe6   : > { %614 = vmatmul.mubr.f32.gmra.mrb[20].mxu0 %v2368_v36 }
  0xe7   : > { %619 = vmatprep.mubr.f32.mxu0 %v1911_v8 }
  0xea   : > { %620 = vmatmul.mubr.f32.gmra.mrb[22].mxu0 %v2373_v37 }
  0xeb   : > { %625 = vmatprep.mubr.f32.mxu0 %v1911_v8 }
  0xee   : > { %626 = vmatmul.mubr.f32.gmra.mrb[24].mxu0 %v2378_v38 }
  0xef   : > { %631 = vmatprep.mubr.f32.mxu0 %v1911_v8 }
  0xf2   : > { %632 = vmatmul.mubr.f32.gmra.mrb[26].mxu0 %v2383_v39 }
  0xf3   : > { %637 = vmatprep.mubr.f32.mxu0 %v1911_v8 }
  0xf6   : > { %638 = vmatmul.mubr.f32.gmra.mrb[28].mxu0 %v2388_v40 }
  0xf7   : > { %643 = vmatprep.mubr.f32.mxu0 %v1911_v8  ;;  %v481_v8 = vsub.s32 0, %v480_v52 }
  0xf9   : > { %v2407_v55 = vrot.slane %v477_v53, %v481_v8 }
  0xfa   : > { %644 = vmatmul.mubr.f32.gmra.mrb[30].mxu0 %v2393_v41 }
 0x191   : > { %v555_v57 = vpop.f32.mrb[0].mxu0 }
 0x192   : > { %v556_v58 = vadd.f32 %v555_v57, %v2407_v55  ;;  %v557_v59 = vpop.f32.mrb[1].mxu0 }
 0x193   : > { %v558_v60 = vadd.f32 %v557_v59, %v2409_v56 }
 0x194   : > { %v650_v63 = vmax.f32 %v556_v58, 0.0 }
 0x195   : > { %v561_v61 = vpop.f32.mrb[2].mxu0  ;;  %v651_v62 = vmax.f32 %v558_v60, 0.0 }
 0x196   : > { %v562_v0 = vadd.f32 %v561_v61, %v2407_v55  ;;  %v563_v1 = vpop.f32.mrb[3].mxu0 }
 0x197   : > { %v564_v2 = vadd.f32 %v563_v1, %v2409_v56  ;;  %794 = vmatprep.mubr.f32.mxu1 %v651_v62 }
 0x198   : > { %795 = vmatmul.mubr.f32.vlgmr.msra.gmra.mrb[0].mxu1 %v650_v63  ;;  %v652_v5 = vmax.f32 %v562_v0, 0.0 }
 0x199   : > { %v653_v3 = vmax.f32 %v564_v2, 0.0  ;;  %v567_v4 = vpop.f32.mrb[4].mxu0 }
 0x19a   : > { %v568_v6 = vadd.f32 %v567_v4, %v2407_v55  ;;  %v569_v7 = vpop.f32.mrb[5].mxu0 }
 0x19b   : > { %v570_v9 = vadd.f32 %v569_v7, %v2409_v56  ;;  %799 = vmatprep.mubr.f32.mxu1 %v653_v3 }
 0x19c   : > { %800 = vmatmul.mubr.f32.gmra.mrb[2].mxu1 %v652_v5  ;;  %v654_v12 = vmax.f32 %v568_v6, 0.0 }
 0x19d   : > { %v655_v10 = vmax.f32 %v570_v9, 0.0  ;;  %v573_v11 = vpop.f32.mrb[6].mxu0 }
 0x19e   : > { %v574_v13 = vadd.f32 %v573_v11, %v2407_v55  ;;  %v575_v14 = vpop.f32.mrb[7].mxu0 }
 0x19f   : > { %v576_v15 = vadd.f32 %v575_v14, %v2409_v56  ;;  %804 = vmatprep.mubr.f32.mxu1 %v655_v10 }
 0x1a0   : > { %805 = vmatmul.mubr.f32.gmra.mrb[4].mxu1 %v654_v12  ;;  %v656_v19 = vmax.f32 %v574_v13, 0.0 }
 0x1a1   : > { %v657_v16 = vmax.f32 %v576_v15, 0.0  ;;  %v579_v17 = vpop.f32.mrb[8].mxu0 }
 0x1a2   : > { %v580_v20 = vadd.f32 %v579_v17, %v2407_v55  ;;  %v581_v21 = vpop.f32.mrb[9].mxu0 }
 0x1a3   : > { %v582_v22 = vadd.f32 %v581_v21, %v2409_v56  ;;  %809 = vmatprep.mubr.f32.mxu1 %v657_v16 }
 0x1a4   : > { %810 = vmatmul.mubr.f32.gmra.mrb[6].mxu1 %v656_v19  ;;  %v658_v26 = vmax.f32 %v580_v20, 0.0 }
 0x1a5   : > { %v659_v23 = vmax.f32 %v582_v22, 0.0  ;;  %v585_v24 = vpop.f32.mrb[10].mxu0 }
 0x1a6   : > { %v586_v27 = vadd.f32 %v585_v24, %v2407_v55  ;;  %v587_v42 = vpop.f32.mrb[11].mxu0 }
 0x1a7   : > { %v588_v43 = vadd.f32 %v587_v42, %v2409_v56  ;;  %814 = vmatprep.mubr.f32.mxu1 %v659_v23 }
 0x1a8   : > { %815 = vmatmul.mubr.f32.gmra.mrb[8].mxu1 %v658_v26  ;;  %v660_v46 = vmax.f32 %v586_v27, 0.0 }
 0x1a9   : > { %v661_v44 = vmax.f32 %v588_v43, 0.0  ;;  %v591_v45 = vpop.f32.mrb[12].mxu0 }
 0x1aa   : > { %v592_v47 = vadd.f32 %v591_v45, %v2407_v55  ;;  %v593_v48 = vpop.f32.mrb[13].mxu0 }
 0x1ab   : > { %v594_v49 = vadd.f32 %v593_v48, %v2409_v56  ;;  %819 = vmatprep.mubr.f32.mxu1 %v661_v44 }
 0x1ac   : > { %820 = vmatmul.mubr.f32.gmra.mrb[10].mxu1 %v660_v46  ;;  %v662_v52 = vmax.f32 %v592_v47, 0.0 }
 0x1ad   : > { %v663_v50 = vmax.f32 %v594_v49, 0.0  ;;  %v597_v51 = vpop.f32.mrb[14].mxu0 }
 0x1ae   : > { %v598_v8 = vadd.f32 %v597_v51, %v2407_v55  ;;  %v599_v53 = vpop.f32.mrb[15].mxu0 }
 0x1af   : > { %v600_v54 = vadd.f32 %v599_v53, %v2409_v56  ;;  %824 = vmatprep.mubr.f32.mxu1 %v663_v50 }
 0x1b0   : > { %825 = vmatmul.mubr.f32.gmra.mrb[12].mxu1 %v662_v52  ;;  %v664_v59 = vmax.f32 %v598_v8, 0.0 }
 0x1b1   : > { %v665_v57 = vmax.f32 %v600_v54, 0.0  ;;  %v603_v58 = vpop.f32.mrb[16].mxu0 }
 0x1b2   : > { %v604_v60 = vadd.f32 %v603_v58, %v2407_v55  ;;  %v605_v61 = vpop.f32.mrb[17].mxu0 }
 0x1b3   : > { %v606_v62 = vadd.f32 %v605_v61, %v2409_v56  ;;  %829 = vmatprep.mubr.f32.mxu1 %v665_v57 }
 0x1b4   : > { %830 = vmatmul.mubr.f32.gmra.mrb[14].mxu1 %v664_v59  ;;  %v666_v1 = vmax.f32 %v604_v60, 0.0 }
 0x1b5   : > { %v667_v63 = vmax.f32 %v606_v62, 0.0  ;;  %v609_v0 = vpop.f32.mrb[18].mxu0  ;;  %v682_v62 = vld [vmem:[#allocation2] sm:$0xff] }
 0x1b6   : > { %v610_v2 = vadd.f32 %v609_v0, %v2407_v55  ;;  %v611_v3 = vpop.f32.mrb[19].mxu0 }
 0x1b7   : > { %v612_v4 = vadd.f32 %v611_v3, %v2409_v56  ;;  %834 = vmatprep.mubr.f32.mxu1 %v667_v63  ;;  %v683_v3 = vld [vmem:[#allocation2 + $0x8] sm:$0xff] }
 0x1b8   : > { %835 = vmatmul.mubr.f32.gmra.mrb[16].mxu1 %v666_v1  ;;  %v668_v7 = vmax.f32 %v610_v2, 0.0 }
 0x1b9   : > { %v669_v5 = vmax.f32 %v612_v4, 0.0  ;;  %v615_v6 = vpop.f32.mrb[20].mxu0 }
 0x1ba   : > { %v616_v9 = vadd.f32 %v615_v6, %v2407_v55  ;;  %v617_v10 = vpop.f32.mrb[21].mxu0 }
 0x1bb   : > { %v618_v11 = vadd.f32 %v617_v10, %v2409_v56  ;;  %839 = vmatprep.mubr.f32.mxu1 %v669_v5 }
 0x1bc   : > { %840 = vmatmul.mubr.f32.gmra.mrb[18].mxu1 %v668_v7  ;;  %v670_v14 = vmax.f32 %v616_v9, 0.0  ;;  %v684_v7 = vld [vmem:[#allocation2 + $0x10] sm:$0xff] }
 0x1bd   : > { %v671_v12 = vmax.f32 %v618_v11, 0.0  ;;  %v621_v13 = vpop.f32.mrb[22].mxu0 }
 0x1be   : > { %v622_v15 = vadd.f32 %v621_v13, %v2407_v55  ;;  %v623_v16 = vpop.f32.mrb[23].mxu0 }
 0x1bf   : > { %v624_v17 = vadd.f32 %v623_v16, %v2409_v56  ;;  %844 = vmatprep.mubr.f32.mxu1 %v671_v12  ;;  %v685_v12 = vld [vmem:[#allocation2 + $0x18] sm:$0xff] }
 0x1c0   : > { %845 = vmatmul.mubr.f32.gmra.mrb[20].mxu1 %v670_v14  ;;  %v672_v21 = vmax.f32 %v622_v15, 0.0 }
 0x1c1   : > { %v673_v19 = vmax.f32 %v624_v17, 0.0  ;;  %v627_v20 = vpop.f32.mrb[24].mxu0  ;;  %v686_v17 = vld [vmem:[#allocation2 + $0x20] sm:$0xff] }
 0x1c2   : > { %v628_v22 = vadd.f32 %v627_v20, %v2407_v55  ;;  %v629_v23 = vpop.f32.mrb[25].mxu0 }
 0x1c3   : > { %v630_v24 = vadd.f32 %v629_v23, %v2409_v56  ;;  %849 = vmatprep.mubr.f32.mxu1 %v673_v19  ;;  %v687_v23 = vld [vmem:[#allocation2 + $0x28] sm:$0xff] }
 0x1c4   : > { %850 = vmatmul.mubr.f32.gmra.mrb[22].mxu1 %v672_v21  ;;  %v674_v42 = vmax.f32 %v628_v22, 0.0 }
 0x1c5   : > { %v675_v26 = vmax.f32 %v630_v24, 0.0  ;;  %v633_v27 = vpop.f32.mrb[26].mxu0 }
 0x1c6   : > { %v634_v43 = vadd.f32 %v633_v27, %v2407_v55  ;;  %v635_v44 = vpop.f32.mrb[27].mxu0 }
 0x1c7   : > { %v636_v45 = vadd.f32 %v635_v44, %v2409_v56  ;;  %854 = vmatprep.mubr.f32.mxu1 %v675_v26 }
 0x1c8   : > { %855 = vmatmul.mubr.f32.gmra.mrb[24].mxu1 %v674_v42  ;;  %v676_v48 = vmax.f32 %v634_v43, 0.0  ;;  %v688_v43 = vld [vmem:[#allocation2 + $0x30] sm:$0xff] }
 0x1c9   : > { %v677_v46 = vmax.f32 %v636_v45, 0.0  ;;  %v639_v47 = vpop.f32.mrb[28].mxu0 }
 0x1ca   : > { %v640_v49 = vadd.f32 %v639_v47, %v2407_v55  ;;  %v641_v50 = vpop.f32.mrb[29].mxu0 }
 0x1cb   : > { %v642_v51 = vadd.f32 %v641_v50, %v2409_v56  ;;  %859 = vmatprep.mubr.f32.mxu1 %v677_v46 }
 0x1cc   : > { %860 = vmatmul.mubr.f32.gmra.mrb[26].mxu1 %v676_v48  ;;  %v678_v53 = vmax.f32 %v640_v49, 0.0  ;;  %v689_v48 = vld [vmem:[#allocation2 + $0x38] sm:$0xff] }
 0x1cd   : > { %v679_v52 = vmax.f32 %v642_v51, 0.0  ;;  %v645_v8 = vpop.f32.mrb[30].mxu0 }
 0x1ce   : > { %v646_v54 = vadd.f32 %v645_v8, %v2407_v55  ;;  %v647_v57 = vpop.f32.mrb[31].mxu0  ;;  %v690_v8 = vld [vmem:[#allocation2 + $0x40] sm:$0xff] }
 0x1cf   : > { %v648_v58 = vadd.f32 %v647_v57, %v2409_v56  ;;  %864 = vmatprep.mubr.f32.mxu1 %v679_v52 }
 0x1d0   : > { %865 = vmatmul.mubr.f32.gmra.mrb[28].mxu1 %v678_v53  ;;  %v680_v60 = vmax.f32 %v646_v54, 0.0 }
 0x1d1   : > { %v681_v59 = vmax.f32 %v648_v58, 0.0 }
 0x1d3   : > { %869 = vmatprep.mubr.f32.mxu1 %v681_v59  ;;  %v691_v59 = vld [vmem:[#allocation2 + $0x48] sm:$0xff] }
 0x1d4   : > { %870 = vmatmul.mubr.f32.gmra.mrb[30].mxu1 %v680_v60 }
 0x26b   : > { %v1419_v61 = vpop.f32.mrb[0].mxu1 }
 0x26c   : > { %v1420_v63 = vpop.f32.mrb[1].mxu1 }
 0x26d   : > { %v1421_v0 = vadd.f32 %v1420_v63, %v1419_v61 }
 0x26f   : > { %v875_v1 = vadd.f32 %v1421_v0, %v682_v62  ;;  %v1422_v2 = vpop.f32.mrb[2].mxu1  ;;  %v692_v0 = vld [vmem:[#allocation2 + $0x50] sm:$0xff] }
 0x270   : > { %v1423_v4 = vpop.f32.mrb[3].mxu1 }
 0x271   : > { %891 = vst [vmem:[#allocation2] sm:$0xff] %v875_v1  ;;  %v1424_v5 = vadd.f32 %v1423_v4, %v1422_v2 }
 0x273   : > { %v876_v55 = vadd.f32 %v1424_v5, %v683_v3  ;;  %v1425_v6 = vpop.f32.mrb[4].mxu1  ;;  %v693_v5 = vld [vmem:[#allocation2 + $0x58] sm:$0xff] }
 0x274   : > { %v1426_v56 = vpop.f32.mrb[5].mxu1 }
 0x275   : > { %892 = vst [vmem:[#allocation2 + $0x8] sm:$0xff] %v876_v55  ;;  %v1427_v9 = vadd.f32 %v1426_v56, %v1425_v6 }
 0x277   : > { %v877_v10 = vadd.f32 %v1427_v9, %v684_v7  ;;  %v1428_v11 = vpop.f32.mrb[6].mxu1  ;;  %v694_v9 = vld [vmem:[#allocation2 + $0x60] sm:$0xff] }
 0x278   : > { %v1429_v13 = vpop.f32.mrb[7].mxu1 }
 0x279   : > { %893 = vst [vmem:[#allocation2 + $0x10] sm:$0xff] %v877_v10  ;;  %v1430_v14 = vadd.f32 %v1429_v13, %v1428_v11 }
 0x27b   : > { %v878_v15 = vadd.f32 %v1430_v14, %v685_v12  ;;  %v1431_v16 = vpop.f32.mrb[8].mxu1  ;;  %v695_v14 = vld [vmem:[#allocation2 + $0x68] sm:$0xff] }
 0x27c   : > { %v1432_v19 = vpop.f32.mrb[9].mxu1 }
 0x27d   : > { %894 = vst [vmem:[#allocation2 + $0x18] sm:$0xff] %v878_v15  ;;  %v1433_v20 = vadd.f32 %v1432_v19, %v1431_v16 }
 0x27f   : > { %v879_v21 = vadd.f32 %v1433_v20, %v686_v17  ;;  %v1434_v22 = vpop.f32.mrb[10].mxu1  ;;  %v696_v20 = vld [vmem:[#allocation2 + $0x70] sm:$0xff] }
 0x280   : > { %v1435_v24 = vpop.f32.mrb[11].mxu1 }
 0x281   : > { %895 = vst [vmem:[#allocation2 + $0x20] sm:$0xff] %v879_v21  ;;  %v1436_v26 = vadd.f32 %v1435_v24, %v1434_v22 }
 0x283   : > { %v880_v27 = vadd.f32 %v1436_v26, %v687_v23  ;;  %v1437_v42 = vpop.f32.mrb[12].mxu1  ;;  %v697_v26 = vld [vmem:[#allocation2 + $0x78] sm:$0xff] }
 0x284   : > { %v1438_v44 = vpop.f32.mrb[13].mxu1 }
 0x285   : > { %896 = vst [vmem:[#allocation2 + $0x28] sm:$0xff] %v880_v27  ;;  %v1439_v45 = vadd.f32 %v1438_v44, %v1437_v42  ;;  %v911_v44 = vld [vmem:[#allocation2] sm:$0xff] (!%p1374_p2) }
 0x287   : > { %v881_v46 = vadd.f32 %v1439_v45, %v688_v43  ;;  %v1440_v47 = vpop.f32.mrb[14].mxu1  ;;  %v1375_v45 = vld [vmem:[%s2767_s24] ss:$0 sm:$0xff] (!%p1374_p2) }
 0x288   : > { %v1441_v49 = vpop.f32.mrb[15].mxu1 }
 0x289   : > { %897 = vst [vmem:[#allocation2 + $0x30] sm:$0xff] %v881_v46  ;;  %v1442_v50 = vadd.f32 %v1441_v49, %v1440_v47  ;;  %v913_v46 = vld [vmem:[#allocation2 + $0x10] sm:$0xff] (!%p1374_p2)  ;;  %v934_v47 = vadd.f32 (!%p1374_p2), %v1375_v45, %v911_v44  ;;  %v912_v49 = vld [vmem:[#allocation2 + $0x8] sm:$0xff] (!%p1374_p2) }
 0x28b   : > { %v882_v51 = vadd.f32 %v1442_v50, %v689_v48  ;;  %v1443_v52 = vpop.f32.mrb[16].mxu1  ;;  %v936_v48 = vadd.f32 (!%p1374_p2), %v1375_v45, %v913_v46  ;;  %v914_v50 = vld [vmem:[#allocation2 + $0x18] sm:$0xff] (!%p1374_p2) }
 0x28c   : > { %v1444_v53 = vpop.f32.mrb[17].mxu1 }
 0x28d   : > { %898 = vst [vmem:[#allocation2 + $0x38] sm:$0xff] %v882_v51  ;;  %v1445_v54 = vadd.f32 %v1444_v53, %v1443_v52  ;;  %v915_v51 = vld [vmem:[#allocation2 + $0x20] sm:$0xff] (!%p1374_p2)  ;;  %v935_v52 = vadd.f32 (!%p1374_p2), %v1375_v45, %v912_v49  ;;  %v916_v53 = vld [vmem:[#allocation2 + $0x28] sm:$0xff] (!%p1374_p2) }
 0x28f   : > { %v883_v57 = vadd.f32 %v1445_v54, %v690_v8  ;;  %v1446_v58 = vpop.f32.mrb[18].mxu1  ;;  %v937_v8 = vadd.f32 (!%p1374_p2), %v1375_v45, %v914_v50  ;;  %v950_v54 = vadd.f32 (!%p1374_p2), %v934_v47, %v2314_v18 }
 0x290   : > { %v1447_v60 = vpop.f32.mrb[19].mxu1 }
 0x291   : > { %899 = vst [vmem:[#allocation2 + $0x40] sm:$0xff] %v883_v57  ;;  %v1448_v61 = vadd.f32 %v1447_v60, %v1446_v58  ;;  %v952_v57 = vadd.f32 (!%p1374_p2), %v936_v48, %v2328_v28  ;;  %v938_v58 = vadd.f32 (!%p1374_p2), %v1375_v45, %v915_v51  ;;  %966 = vadd.xlane.f32.xlu0 (!%p1374_p2), %v950_v54 }
 0x292   : > { %v953_v60 = vadd.f32 (!%p1374_p2), %v937_v8, %v2333_v29 }
 0x293   : > { %v884_v62 = vadd.f32 %v1448_v61, %v691_v59  ;;  %v1449_v63 = vpop.f32.mrb[20].mxu1  ;;  %970 = vadd.xlane.f32.xlu1 (!%p1374_p2), %v952_v57  ;;  %v951_v59 = vadd.f32 (!%p1374_p2), %v935_v52, %v2323_v25  ;;  %v939_v61 = vadd.f32 (!%p1374_p2), %v1375_v45, %v916_v53 }
 0x294   : > { %v1450_v1 = vpop.f32.mrb[21].mxu1 }
 0x295   : > { %900 = vst [vmem:[#allocation2 + $0x48] sm:$0xff] %v884_v62  ;;  %v1451_v2 = vadd.f32 %v1450_v1, %v1449_v63  ;;  %v917_v62 = vld [vmem:[#allocation2 + $0x30] sm:$0xff] (!%p1374_p2)  ;;  %v918_v63 = vld [vmem:[#allocation2 + $0x38] sm:$0xff] (!%p1374_p2)  ;;  %968 = vadd.xlane.f32.xlu0 (!%p1374_p2), %v951_v59  ;;  %v954_v1 = vadd.f32 (!%p1374_p2), %v938_v58, %v2338_v30 }
 0x296   : > { %v941_v18 = vadd.f32 (!%p1374_p2), %v1375_v45, %v918_v63 }
 0x297   : > { %v885_v3 = vadd.f32 %v1451_v2, %v692_v0  ;;  %v1452_v4 = vpop.f32.mrb[22].mxu1  ;;  %v940_v0 = vadd.f32 (!%p1374_p2), %v1375_v45, %v917_v62  ;;  %972 = vadd.xlane.f32.xlu1 (!%p1374_p2), %v953_v60  ;;  %v2453_v2 = vadd.f32 (!%p1374_p2), %v939_v61, %v2343_v31 }
 0x298   : > { %v1453_v55 = vpop.f32.mrb[23].mxu1  ;;  %v919_v28 = vld [vmem:[#allocation2 + $0x40] sm:$0xff] (!%p1374_p2)  ;;  %v2460_v25 = vadd.f32 (!%p1374_p2), %v941_v18, %v2353_v33 }
 0x299   : > { %901 = vst [vmem:[#allocation2 + $0x50] sm:$0xff] %v885_v3  ;;  %v1454_v6 = vadd.f32 %v1453_v55, %v1452_v4  ;;  %v2456_v4 = vadd.f32 (!%p1374_p2), %v940_v0, %v2348_v32  ;;  %974 = vadd.xlane.f32.xlu0 (!%p1374_p2), %v954_v1  ;;  %v942_v29 = vadd.f32 (!%p1374_p2), %v1375_v45, %v919_v28 }
 0x29b   : > { %v886_v7 = vadd.f32 %v1454_v6, %v693_v5  ;;  %v1455_v56 = vpop.f32.mrb[24].mxu1  ;;  %976 = vadd.xlane.f32.xlu1 (!%p1374_p2), %v2453_v2  ;;  %v2465_v31 = vadd.f32 (!%p1374_p2), %v942_v29, %v2358_v34 }
 0x29c   : > { %v1456_v10 = vpop.f32.mrb[25].mxu1  ;;  %v920_v3 = vld [vmem:[#allocation2 + $0x48] sm:$0xff] (!%p1374_p2) }
 0x29d   : > { %902 = vst [vmem:[#allocation2 + $0x58] sm:$0xff] %v886_v7  ;;  %v1457_v11 = vadd.f32 %v1456_v10, %v1455_v56  ;;  %v943_v5 = vadd.f32 (!%p1374_p2), %v1375_v45, %v920_v3  ;;  %978 = vadd.xlane.f32.xlu0 (!%p1374_p2), %v2456_v4 }
 0x29f   : > { %v887_v12 = vadd.f32 %v1457_v11, %v694_v9  ;;  %v1458_v13 = vpop.f32.mrb[26].mxu1  ;;  %980 = vadd.xlane.f32.xlu1 (!%p1374_p2), %v2460_v25  ;;  %v2468_v32 = vadd.f32 (!%p1374_p2), %v943_v5, %v2363_v35 }
 0x2a0   : > { %v1459_v15 = vpop.f32.mrb[27].mxu1  ;;  %v921_v55 = vld [vmem:[#allocation2 + $0x50] sm:$0xff] (!%p1374_p2) }
 0x2a1   : > { %903 = vst [vmem:[#allocation2 + $0x60] sm:$0xff] %v887_v12  ;;  %v1460_v16 = vadd.f32 %v1459_v15, %v1458_v13  ;;  %v944_v30 = vadd.f32 (!%p1374_p2), %v1375_v45, %v921_v55  ;;  %982 = vadd.xlane.f32.xlu0 (!%p1374_p2), %v2465_v31 }
 0x2a3   : > { %v888_v17 = vadd.f32 %v1460_v16, %v695_v14  ;;  %v1461_v19 = vpop.f32.mrb[28].mxu1  ;;  %984 = vadd.xlane.f32.xlu1 (!%p1374_p2), %v2468_v32  ;;  %v2473_v10 = vadd.f32 (!%p1374_p2), %v944_v30, %v2368_v36 }
 0x2a4   : > { %v1462_v21 = vpop.f32.mrb[29].mxu1  ;;  %v922_v6 = vld [vmem:[#allocation2 + $0x58] sm:$0xff] (!%p1374_p2) }
 0x2a5   : > { %904 = vst [vmem:[#allocation2 + $0x68] sm:$0xff] %v888_v17  ;;  %v1463_v22 = vadd.f32 %v1462_v21, %v1461_v19  ;;  %v945_v7 = vadd.f32 (!%p1374_p2), %v1375_v45, %v922_v6  ;;  %986 = vadd.xlane.f32.xlu0 (!%p1374_p2), %v2473_v10 }
 0x2a7   : > { %v889_v23 = vadd.f32 %v1463_v22, %v696_v20  ;;  %v1464_v24 = vpop.f32.mrb[30].mxu1  ;;  %910 = sbr.rel (%p1374_p2) target bundleno = 1009 (0x3f1), region = 68  ;;  %v2476_v11 = vadd.f32 (!%p1374_p2), %v945_v7, %v2373_v37 }
 0x2a8   : > { %v1465_v27 = vpop.f32.mrb[31].mxu1  ;;  %v923_v56 = vld [vmem:[#allocation2 + $0x60] sm:$0xff] (!%p1374_p2) }
 0x2a9   : > { %905 = vst [vmem:[#allocation2 + $0x70] sm:$0xff] %v889_v23  ;;  %v1466_v42 = vadd.f32 %v1465_v27, %v1464_v24  ;;  %v946_v33 = vadd.f32 (!%p1374_p2), %v1375_v45, %v923_v56  ;;  %988 = vadd.xlane.f32.xlu1 (!%p1374_p2), %v2476_v11 }
 0x2ab   : > { %v890_v43 = vadd.f32 %v1466_v42, %v697_v26  ;;  %v2481_v35 = vadd.f32 (!%p1374_p2), %v946_v33, %v2378_v38 }
 0x2ac   : > { %v924_v9 = vld [vmem:[#allocation2 + $0x68] sm:$0xff] (!%p1374_p2) }
 0x2ad   : > { %906 = vst [vmem:[#allocation2 + $0x78] sm:$0xff] %v890_v43  ;;  %v947_v12 = vadd.f32 (!%p1374_p2), %v1375_v45, %v924_v9  ;;  %990 = vadd.xlane.f32.xlu0 (!%p1374_p2), %v2481_v35 }
 0x2af   : > { %v2484_v15 = vadd.f32 %v947_v12, %v2383_v39 }
 0x2b0   : > { %v925_v34 = vld [vmem:[#allocation2 + $0x70] sm:$0xff] }
 0x2b1   : > { %v948_v14 = vadd.f32 %v1375_v45, %v925_v34  ;;  %992 = vadd.xlane.f32.xlu1 %v2484_v15 }
 0x2b3   : > { %v2489_v36 = vadd.f32 %v948_v14, %v2388_v40 }
 0x2b4   : > { %v926_v13 = vld [vmem:[#allocation2 + $0x78] sm:$0xff] }
 0x2b5   : > { %v949_v16 = vadd.f32 %v1375_v45, %v926_v13  ;;  %994 = vadd.xlane.f32.xlu0 %v2489_v36 }
 0x2b7   : > { %v2492_v37 = vadd.f32 %v949_v16, %v2393_v41 }
 0x2b9   : > { %996 = vadd.xlane.f32.xlu1 %v2492_v37 }
 0x31e   : > { %v967_v38 = vpop.xlane.xlu0 %966 }
 0x31f   : > { %v998_v19 = vmul.f32 0.0078125, %v967_v38 }
 0x320   : > { %v971_v17 = vpop.xlane.xlu1 %970 }
 0x321   : > { %v1000_v39 = vmul.f32 0.0078125, %v971_v17  ;;  %v2496_v20 = vsub.f32 %v950_v54, %v998_v19 }
 0x322   : > { %v969_v22 = vpop.xlane.xlu0 %968 }
 0x323   : > { %v2498_v21 = vsub.f32 %v952_v57, %v1000_v39  ;;  %v999_v24 = vmul.f32 0.0078125, %v969_v22  ;;  %v1030_v40 = vmul.f32 %v2496_v20, %v2496_v20 }
 0x324   : > { %v973_v23 = vpop.xlane.xlu1 %972 }
 0x325   : > { %v1001_v41 = vmul.f32 0.0078125, %v973_v23  ;;  %v2502_v26 = vsub.f32 %v951_v59, %v999_v24  ;;  %1046 = vadd.xlane.f32.xlu0 %v1030_v40  ;;  %v1032_v42 = vmul.f32 %v2498_v21, %v2498_v21 }
 0x326   : > { %v975_v43 = vpop.xlane.xlu0 %974 }
 0x327   : > { %v2504_v27 = vsub.f32 %v953_v60, %v1001_v41  ;;  %v1002_v45 = vmul.f32 0.0078125, %v975_v43  ;;  %v1031_v46 = vmul.f32 %v2502_v26, %v2502_v26 }
 0x328   : > { %v977_v44 = vpop.xlane.xlu1 %976 }
 0x329   : > { %v1003_v47 = vmul.f32 0.0078125, %v977_v44  ;;  %v2510_v48 = vsub.f32 %v954_v1, %v1002_v45  ;;  %1050 = vadd.xlane.f32.xlu0 %v1032_v42  ;;  %1048 = vadd.xlane.f32.xlu1 %v1031_v46  ;;  %v1033_v50 = vmul.f32 %v2504_v27, %v2504_v27 }
 0x32a   : > { %v979_v51 = vpop.xlane.xlu0 %978 }
 0x32b   : > { %v2513_v49 = vsub.f32 %v2453_v2, %v1003_v47  ;;  %v1004_v8 = vmul.f32 0.0078125, %v979_v51  ;;  %v1034_v53 = vmul.f32 %v2510_v48, %v2510_v48 }
 0x32c   : > { %v981_v52 = vpop.xlane.xlu1 %980 }
 0x32d   : > { %v1005_v54 = vmul.f32 0.0078125, %v981_v52  ;;  %v2520_v57 = vsub.f32 %v2456_v4, %v1004_v8  ;;  %1052 = vadd.xlane.f32.xlu1 %v1033_v50  ;;  %1054 = vadd.xlane.f32.xlu0 %v1034_v53  ;;  %v1035_v59 = vmul.f32 %v2513_v49, %v2513_v49 }
 0x32e   : > { %v983_v60 = vpop.xlane.xlu0 %982 }
 0x32f   : > { %v2523_v58 = vsub.f32 %v2460_v25, %v1005_v54  ;;  %v1006_v62 = vmul.f32 0.0078125, %v983_v60  ;;  %v1036_v63 = vmul.f32 %v2520_v57, %v2520_v57  ;;  %v2574_v54 = vld [vmem:[%s2768_s19] ss:$0 sm:$0xff] }
 0x330   : > { %v985_v61 = vpop.xlane.xlu1 %984 }
 0x331   : > { %v1007_v0 = vmul.f32 0.0078125, %v985_v61  ;;  %v2530_v1 = vsub.f32 %v2465_v31, %v1006_v62  ;;  %1056 = vadd.xlane.f32.xlu1 %v1035_v59  ;;  %1058 = vadd.xlane.f32.xlu0 %v1036_v63  ;;  %v1037_v18 = vmul.f32 %v2523_v58, %v2523_v58 }
 0x332   : > { %v987_v28 = vpop.xlane.xlu0 %986 }
 0x333   : > { %v2533_v2 = vsub.f32 %v2468_v32, %v1007_v0  ;;  %v1008_v4 = vmul.f32 0.0078125, %v987_v28  ;;  %v1038_v25 = vmul.f32 %v2530_v1, %v2530_v1  ;;  %v2580_v0 = vld [vmem:[%s2769_s14] ss:$0 sm:$0xff] }
 0x335   : > { %v2540_v5 = vsub.f32 %v2473_v10, %v1008_v4  ;;  %1060 = vadd.xlane.f32.xlu1 %v1037_v18  ;;  %1062 = vadd.xlane.f32.xlu0 %v1038_v25  ;;  %v1039_v6 = vmul.f32 %v2533_v2, %v2533_v2 }
 0x336   : > { %v989_v3 = vpop.xlane.xlu1 %988 }
 0x337   : > { %v1009_v29 = vmul.f32 0.0078125, %v989_v3  ;;  %v1040_v7 = vmul.f32 %v2540_v5, %v2540_v5 }
 0x339   : > { %v2543_v55 = vsub.f32 %v2476_v11, %v1009_v29  ;;  %1064 = vadd.xlane.f32.xlu1 %v1039_v6  ;;  %1066 = vadd.xlane.f32.xlu0 %v1040_v7 }
 0x33a   : > { %v991_v30 = vpop.xlane.xlu0 %990 }
 0x33b   : > { %v1010_v32 = vmul.f32 0.0078125, %v991_v30  ;;  %v1041_v10 = vmul.f32 %v2543_v55, %v2543_v55 }
 0x33d   : > { %v2550_v9 = vsub.f32 %v2481_v35, %v1010_v32  ;;  %1068 = vadd.xlane.f32.xlu1 %v1041_v10 }
 0x33e   : > { %v993_v31 = vpop.xlane.xlu1 %992 }
 0x33f   : > { %v1011_v56 = vmul.f32 0.0078125, %v993_v31  ;;  %v1042_v13 = vmul.f32 %v2550_v9, %v2550_v9 }
 0x341   : > { %v2553_v33 = vsub.f32 %v2484_v15, %v1011_v56  ;;  %1070 = vadd.xlane.f32.xlu0 %v1042_v13 }
 0x342   : > { %v995_v11 = vpop.xlane.xlu0 %994 }
 0x343   : > { %v1012_v34 = vmul.f32 0.0078125, %v995_v11  ;;  %v1043_v15 = vmul.f32 %v2553_v33, %v2553_v33 }
 0x345   : > { %v2560_v16 = vsub.f32 %v2489_v36, %v1012_v34  ;;  %1072 = vadd.xlane.f32.xlu1 %v1043_v15 }
 0x346   : > { %v997_v12 = vpop.xlane.xlu1 %996 }
 0x347   : > { %v1013_v14 = vmul.f32 0.0078125, %v997_v12  ;;  %v1044_v38 = vmul.f32 %v2560_v16, %v2560_v16 }
 0x349   : > { %v2563_v35 = vsub.f32 %v2492_v37, %v1013_v14  ;;  %1074 = vadd.xlane.f32.xlu0 %v1044_v38 }
 0x34b   : > { %v1045_v17 = vmul.f32 %v2563_v35, %v2563_v35 }
 0x34d   : > { %1076 = vadd.xlane.f32.xlu1 %v1045_v17 }
 0x3b2   : > { %v1047_v19 = vpop.xlane.xlu0 %1046 }
 0x3b3   : > { %v1078_v36 = vmul.f32 0.0078125, %v1047_v19 }
 0x3b5   : > { %v1094_v39 = vadd.f32 1e-05, %v1078_v36 }
 0x3b6   : > { %v1049_v22 = vpop.xlane.xlu1 %1048  ;;  %v1051_v23 = vpop.xlane.xlu0 %1050 }
 0x3b7   : > { %1652 = vrsqrt.f32 %v1094_v39  ;;  %v1079_v37 = vmul.f32 0.0078125, %v1049_v22  ;;  %v1080_v24 = vmul.f32 0.0078125, %v1051_v23 }
 0x3b9   : > { %v1095_v40 = vadd.f32 1e-05, %v1079_v37  ;;  %v1096_v41 = vadd.f32 1e-05, %v1080_v24 }
 0x3ba   : > { %v1053_v42 = vpop.xlane.xlu1 %1052  ;;  %v1055_v43 = vpop.xlane.xlu0 %1054 }
 0x3bb   : > { %1654 = vrsqrt.f32 %v1095_v40  ;;  %v1081_v44 = vmul.f32 0.0078125, %v1053_v42  ;;  %v1082_v45 = vmul.f32 0.0078125, %v1055_v43 }
 0x3bc   : > { %1656 = vrsqrt.f32 %v1096_v41 }
 0x3bd   : > { %v1097_v46 = vadd.f32 1e-05, %v1081_v44  ;;  %v1098_v47 = vadd.f32 1e-05, %v1082_v45 }
 0x3be   : > { %v1057_v50 = vpop.xlane.xlu1 %1056  ;;  %v1059_v51 = vpop.xlane.xlu0 %1058 }
 0x3bf   : > { %1658 = vrsqrt.f32 %v1097_v46  ;;  %v1083_v52 = vmul.f32 0.0078125, %v1057_v50  ;;  %v1084_v8 = vmul.f32 0.0078125, %v1059_v51 }
 0x3c0   : > { %1660 = vrsqrt.f32 %v1098_v47 }
 0x3c1   : > { %v1653_v53 = vpop.eup %1652  ;;  %v1099_v59 = vadd.f32 1e-05, %v1083_v52  ;;  %v1100_v60 = vadd.f32 1e-05, %v1084_v8 }
 0x3c2   : > { %v1126_v61 = vmul.f32 %v1653_v53, %v2496_v20  ;;  %v1061_v62 = vpop.xlane.xlu1 %1060  ;;  %v1063_v63 = vpop.xlane.xlu0 %1062 }
 0x3c3   : > { %1662 = vrsqrt.f32 %v1099_v59  ;;  %v1085_v18 = vmul.f32 0.0078125, %v1061_v62  ;;  %v1086_v28 = vmul.f32 0.0078125, %v1063_v63 }
 0x3c4   : > { %v1149_v3 = vmul.f32 %v2574_v54, %v1126_v61  ;;  %1664 = vrsqrt.f32 %v1100_v60 }
 0x3c5   : > { %v1655_v4 = vpop.eup %1654  ;;  %v1101_v25 = vadd.f32 1e-05, %v1085_v18  ;;  %v1102_v29 = vadd.f32 1e-05, %v1086_v28 }
 0x3c6   : > { %v1657_v6 = vpop.eup %1656  ;;  %v1172_v20 = vadd.f32 %v2580_v0, %v1149_v3  ;;  %v1127_v30 = vmul.f32 %v1655_v4, %v2502_v26  ;;  %v1065_v31 = vpop.xlane.xlu1 %1064 }
 0x3c7   : > { %v1067_v32 = vpop.xlane.xlu0 %1066  ;;  %v1128_v7 = vmul.f32 %v1657_v6, %v2498_v21  ;;  %1666 = vrsqrt.f32 %v1101_v25  ;;  %v1087_v56 = vmul.f32 0.0078125, %v1065_v31 }
 0x3c8   : > { %v1088_v10 = vmul.f32 0.0078125, %v1067_v32  ;;  %1188 = vst [vmem:[%s2255_s17] sm:$0xff] %v1172_v20  ;;  %v1150_v11 = vmul.f32 %v2574_v54, %v1127_v30  ;;  %1668 = vrsqrt.f32 %v1102_v29 }
 0x3c9   : > { %v1659_v12 = vpop.eup %1658  ;;  %v1151_v34 = vmul.f32 %v2574_v54, %v1128_v7  ;;  %v1103_v13 = vadd.f32 1e-05, %v1087_v56 }
 0x3ca   : > { %v1104_v14 = vadd.f32 1e-05, %v1088_v10  ;;  %v1661_v15 = vpop.eup %1660  ;;  %v1173_v26 = vadd.f32 %v2580_v0, %v1150_v11  ;;  %v1129_v38 = vmul.f32 %v1659_v12, %v2504_v27  ;;  %v1069_v21 = vpop.xlane.xlu1 %1068 }
 0x3cb   : > { %v1174_v19 = vadd.f32 %v2580_v0, %v1151_v34  ;;  %v1130_v36 = vmul.f32 %v1661_v15, %v2510_v48  ;;  %1670 = vrsqrt.f32 %v1103_v13  ;;  %v1089_v39 = vmul.f32 0.0078125, %v1069_v21 }
 0x3cc   : > { %1189 = vst [vmem:[%s2255_s17 + $0x8] sm:$0xff] %v1173_v26  ;;  %v1152_v22 = vmul.f32 %v2574_v54, %v1129_v38  ;;  %1672 = vrsqrt.f32 %v1104_v14 }
 0x3cd   : > { %v1663_v37 = vpop.eup %1662  ;;  %1190 = vst [vmem:[%s2255_s17 + $0x10] sm:$0xff] %v1174_v19  ;;  %v1153_v24 = vmul.f32 %v2574_v54, %v1130_v36  ;;  %v1105_v40 = vadd.f32 1e-05, %v1089_v39 }
 0x3ce   : > { %v1071_v17 = vpop.xlane.xlu0 %1070  ;;  %v1665_v27 = vpop.eup %1664  ;;  %v1175_v41 = vadd.f32 %v2580_v0, %v1152_v22  ;;  %v1131_v42 = vmul.f32 %v1663_v37, %v2513_v49 }
 0x3cf   : > { %v1090_v23 = vmul.f32 0.0078125, %v1071_v17  ;;  %v1176_v45 = vadd.f32 %v2580_v0, %v1153_v24  ;;  %v1132_v46 = vmul.f32 %v1665_v27, %v2520_v57  ;;  %1674 = vrsqrt.f32 %v1105_v40 }
 0x3d0   : > { %1191 = vst [vmem:[%s2255_s17 + $0x18] sm:$0xff] %v1175_v41  ;;  %v1154_v50 = vmul.f32 %v2574_v54, %v1131_v42 }
 0x3d1   : > { %v1106_v48 = vadd.f32 1e-05, %v1090_v23  ;;  %v1667_v52 = vpop.eup %1666  ;;  %1192 = vst [vmem:[%s2255_s17 + $0x20] sm:$0xff] %v1176_v45  ;;  %v1155_v49 = vmul.f32 %v2574_v54, %v1132_v46 }
 0x3d2   : > { %v1073_v43 = vpop.xlane.xlu1 %1072  ;;  %v1669_v53 = vpop.eup %1668  ;;  %v1177_v59 = vadd.f32 %v2580_v0, %v1154_v50  ;;  %v1133_v60 = vmul.f32 %v1667_v52, %v2523_v58 }
 0x3d3   : > { %v1091_v47 = vmul.f32 0.0078125, %v1073_v43  ;;  %1676 = vrsqrt.f32 %v1106_v48  ;;  %v1178_v62 = vadd.f32 %v2580_v0, %v1155_v49  ;;  %v1134_v63 = vmul.f32 %v1669_v53, %v2530_v1 }
 0x3d4   : > { %1193 = vst [vmem:[%s2255_s17 + $0x28] sm:$0xff] %v1177_v59  ;;  %v1156_v28 = vmul.f32 %v2574_v54, %v1133_v60 }
 0x3d5   : > { %v1107_v8 = vadd.f32 1e-05, %v1091_v47  ;;  %v1671_v3 = vpop.eup %1670  ;;  %1194 = vst [vmem:[%s2255_s17 + $0x30] sm:$0xff] %v1178_v62  ;;  %v1157_v4 = vmul.f32 %v2574_v54, %v1134_v63 }
 0x3d6   : > { %v1075_v44 = vpop.xlane.xlu0 %1074  ;;  %v1673_v58 = vpop.eup %1672  ;;  %v1179_v29 = vadd.f32 %v2580_v0, %v1156_v28  ;;  %v1135_v6 = vmul.f32 %v1671_v3, %v2533_v2 }
 0x3d7   : > { %v1092_v51 = vmul.f32 0.0078125, %v1075_v44  ;;  %1678 = vrsqrt.f32 %v1107_v8  ;;  %v1180_v1 = vadd.f32 %v2580_v0, %v1157_v4  ;;  %v1136_v20 = vmul.f32 %v1673_v58, %v2540_v5 }
 0x3d8   : > { %1195 = vst [vmem:[%s2255_s17 + $0x38] sm:$0xff] %v1179_v29  ;;  %v1158_v30 = vmul.f32 %v2574_v54, %v1135_v6 }
 0x3d9   : > { %v1108_v57 = vadd.f32 1e-05, %v1092_v51  ;;  %v1675_v31 = vpop.eup %1674  ;;  %1196 = vst [vmem:[%s2255_s17 + $0x40] sm:$0xff] %v1180_v1  ;;  %v1159_v32 = vmul.f32 %v2574_v54, %v1136_v20 }
 0x3da   : > { %v1077_v61 = vpop.xlane.xlu1 %1076  ;;  %v1181_v56 = vadd.f32 %v2580_v0, %v1158_v30  ;;  %v1137_v10 = vmul.f32 %v1675_v31, %v2543_v55 }
 0x3db   : > { %v1093_v18 = vmul.f32 0.0078125, %v1077_v61  ;;  %1680 = vrsqrt.f32 %v1108_v57  ;;  %v1182_v2 = vadd.f32 %v2580_v0, %v1159_v32 }
 0x3dc   : > { %1197 = vst [vmem:[%s2255_s17 + $0x48] sm:$0xff] %v1181_v56  ;;  %v1160_v5 = vmul.f32 %v2574_v54, %v1137_v10 }
 0x3dd   : > { %v1109_v25 = vadd.f32 1e-05, %v1093_v18  ;;  %v1677_v7 = vpop.eup %1676  ;;  %1198 = vst [vmem:[%s2255_s17 + $0x50] sm:$0xff] %v1182_v2 }
 0x3de   : > { %v1138_v11 = vmul.f32 %v1677_v7, %v2550_v9  ;;  %v1183_v14 = vadd.f32 %v2580_v0, %v1160_v5 }
 0x3df   : > { %1682 = vrsqrt.f32 %v1109_v25 }
 0x3e0   : > { %v1161_v34 = vmul.f32 %v2574_v54, %v1138_v11  ;;  %1199 = vst [vmem:[%s2255_s17 + $0x58] sm:$0xff] %v1183_v14 }
 0x3e1   : > { %v1679_v12 = vpop.eup %1678 }
 0x3e2   : > { %v1139_v55 = vmul.f32 %v1679_v12, %v2553_v33  ;;  %v1184_v15 = vadd.f32 %v2580_v0, %v1161_v34 }
 0x3e4   : > { %v1162_v9 = vmul.f32 %v2574_v54, %v1139_v55  ;;  %1200 = vst [vmem:[%s2255_s17 + $0x60] sm:$0xff] %v1184_v15 }
 0x3e5   : > { %v1681_v13 = vpop.eup %1680 }
 0x3e6   : > { %v1140_v26 = vmul.f32 %v1681_v13, %v2560_v16  ;;  %v1185_v17 = vadd.f32 %v2580_v0, %v1162_v9 }
 0x3e8   : > { %v1163_v21 = vmul.f32 %v2574_v54, %v1140_v26  ;;  %1201 = vst [vmem:[%s2255_s17 + $0x68] sm:$0xff] %v1185_v17 }
 0x3e9   : > { %v1683_v38 = vpop.eup %1682 }
 0x3ea   : > { %v1141_v19 = vmul.f32 %v1683_v38, %v2563_v35  ;;  %v1186_v36 = vadd.f32 %v2580_v0, %v1163_v21 }
 0x3ec   : > { %v1164_v33 = vmul.f32 %v2574_v54, %v1141_v19  ;;  %1202 = vst [vmem:[%s2255_s17 + $0x70] sm:$0xff] %v1186_v36 }
 0x3ee   : > { %v1187_v39 = vadd.f32 %v2580_v0, %v1164_v33 }
 0x3f0   : > { %1203 = vst [vmem:[%s2255_s17 + $0x78] sm:$0xff] %v1187_v39 }
 0x3f1 PF: > { %s2770_s16 = sld [smem:[#allocation15_spill]]  ;;  %s1218_s12 = sshll.u32 %s2255_s17, 4  ;;  %s2652_s12 = int_to_ptr.vmem [resolvable:$true] %s1218_s12 }
 0x3f2   : > { %s2771_s13 = sld [smem:[#allocation25_spill]]  ;;  %s1205_s1 = scalar_lea.sflag [#allocation5], %s2228_s29 }
 0x3f3   : > { %s1774_s23 = scalar_lea.vmem %s2652_s12, 2048  ;;  %p2772_p11 = scmp.ne.s32.totalorder %s2757_s21, 0 }
 0x3f4   : > { %p1775_p13 = scmp.ne.s32.totalorder %s2652_s12, %s1774_s23  ;;  %s1912_s5 = smov [#allocation9]  }
 0x3f5   : > { %s1778_s26 = sshll.u32 %s1912_s5, 4  ;;  %s1779_s26 = int_to_ptr.vmem [resolvable:$false] %s1778_s26 }
 0x3f6   : > { %p1776_p6 = pnand %p1775_p13, %p2772_p11  ;;  %s1780_s22 = scalar_lea.vmem %s1779_s26, 4096 }
 0x3f7   : > { %s1386_s8 = sshll.u32 %s2770_s16, 11  ;;  %p1781_p1 = scmp.lt.s32.totalorder %s2652_s12, %s1779_s26 }
 0x3f8   : > { %s2649_s20 = scalar_lea.hbm %s2771_s13, %s1386_s8  ;;  %p1777_p5 = pneg %p1776_p6 }
 0x3f9   : > { %p1782_p0 = scmp.lt.s32.totalorder %s1780_s22, %s1774_s23 }
 0x3fb   : > { %p1783_p9 = por %p1782_p0, %p1781_p1 }
 0x3fd   : > { %p1784_p12 = pnand %p1783_p9, %p1777_p5 }
 0x3ff   : > { %1787 = shalt.err (!%p1784_p12)
}
 0x400   : > { %s1788_s17 = scalar_lea.hbm %s2649_s20, 2048  ;;  %s1792_s10 = scalar_lea.hbm %s2771_s13, 4096 }
 0x401   : > { %p1789_p3 = scmp.ne.s32.totalorder %s2649_s20, %s1788_s17  ;;  %p1793_p8 = scmp.lt.u32.totalorder %s2649_s20, %s2771_s13 }
 0x402   : > { %p1794_p10 = scmp.lt.u32.totalorder %s1792_s10, %s1788_s17  ;;  %p1796_p13 = scmp.lt.u32.totalorder %s1788_s17, %s2649_s20 }
 0x403   : > { %p1790_p4 = pnand %p1789_p3, %p2772_p11 }
 0x404   : > { %p1795_p2 = por %p1794_p10, %p1793_p8 }
 0x405   : > { %p1791_p7 = pneg %p1790_p4 }
 0x406   : > { %p1797_p6 = por %p1796_p13, %p1795_p2 }
 0x408   : > { %p1798_p5 = pnand %p1797_p6, %p1791_p7 }
 0x40a   : > { %1801 = shalt.err (!%p1798_p5)
}
 0x40b   : > { %s1913_s15 = smov 128   ;;  %s1914_s14 = smov 8  }
 0x40c   : > { %1537 = dma.vmem_to_hbm [thread:$0]  (%p2772_p11), %s2652_s12, 2048, %s2649_s20, %s1205_s1, %s1913_s15, %s1913_s15, %s1914_s14  }
 0x40d PF: > { %p1554_p1 = scmp.ge.s32.totalorder %s1900_s11, 2  ;;  %s1233_s16 = sand.u32 1, %s1872_s27  }
 0x40e   : > { %p2773_p0 = scmp.ne.s32.totalorder %s2759_s6, 0  ;;  %s1234_s8 = scalar_lea.sflag [#allocation5], %s1233_s16 }
 0x410   : > { %p1550_p9 = pnand %p1554_p1, %p2773_p0 }
 0x412   : > { %1855 = dma.done.wait (!%p1550_p9), %s1234_s8, 2048  }
 0x413   : > { %1857 = vsyncadd (!%p1550_p9), %s1234_s8, 4294965248  ;;  %s26_s11 = sadd.s32 1, %s1900_s11   ;;  %s2774_s4 = sld [smem:[#allocation13_spill]] }
 0x414   : > { %p23_p12 = scmp.ge.s32.totalorder %s26_s11, 6   ;;  %s2775_s26 = sld [smem:[#allocation18_spill]] }
 0x415   : > { %s2776_s21 = sld [smem:[#allocation14_spill]]  ;;  %s2777_s29 = sld [smem:[#allocation20_spill]] }
 0x416   : > { %s2778_s8 = sld [smem:[#allocation16_spill]]  ;;  %s2779_s7 = sld [smem:[#allocation17_spill]] }
 0x417   : > { %s2780_s10 = sld [smem:[#allocation19_spill]]  ;;  %s2781_s24 = smov %s1864_s25 }
 0x418   : > { %s2783_s27 = smov %s1876_s28  ;;  %s2785_s30 = smov %s1892_s9 }
 0x419   : > { %s2782_s25 = smov %s2774_s4  ;;  %25 = sbr.rel (!%p23_p12) target bundleno = 17 (0x11), region = 128 }
 0x41b   : > { %s2784_s28 = smov %s2776_s21 }
 0x41c   : > { %s2786_s9 = smov %s2779_s7 }
 0x420   :  { %1239 = vsyncpa [#allocation4], 1 }
 0x421   :  { %1241 = vsyncpa [#allocation4 + $0x1], 1 }
 0x422   :  { %1242 = vsyncpa [#allocation7], 1 }
 0x423   :  { %1244 = vsyncpa [#allocation7 + $0x1], 1 }
 0x424   :  { %1245 = vsyncpa [#allocation5], 1 }
 0x425   :  { %1247 = vsyncpa [#allocation5 + $0x1], 1 }

</bundles_post_ra>
